<compile_context>
chip_gen: v7x
topology: tpu7x:2x2x1
jax: 0.10.0
libtpu: 0.0.40
codegen_flags: <defaults>
</compile_context>

<pallas_src>
import math

import jax
import jax.numpy as jnp
import numpy as np
from jax.experimental import pallas as pl
from jax.experimental.pallas import tpu as pltpu


def _mha_kernel(q_ref, k_ref, v_ref,
                wq_ref, wk_ref, wv_ref, wo_ref,
                bq_ref, bk_ref, bv_ref, bo_ref,
                out_ref):
    """One batch-block grid step; all H heads are computed here.

    q/k/v refs:    (Bt, S, Dp)    bf16  (original inputs, lane-padded)
    wq/wk/wv refs: (Dp, H*Dp)     bf16  (composed per-head weights, head-concat)
    wo ref:        (H, Dp, Dp)    bf16
    bq/bk/bv refs: (1, H*Dp)      f32   (composed biases, head-concat)
    bo ref:        (H, 1, Dp)     f32
    out ref:       (H, Bt, S, Dp) bf16
    """
    n_heads, _, dp = wo_ref.shape

    # All-head projections of the ORIGINAL q/k/v: three wide MXU matmuls with
    # f32 accumulation.  1/sqrt(d_k) is already folded into wq/bq.
    q_all = jnp.einsum('bsd,dn->bsn', q_ref[...], wq_ref[...],
                       preferred_element_type=jnp.float32) + bq_ref[...]
    k_all = jnp.einsum('bsd,dn->bsn', k_ref[...], wk_ref[...],
                       preferred_element_type=jnp.float32) + bk_ref[...]
    v_all = jnp.einsum('bsd,dn->bsn', v_ref[...], wv_ref[...],
                       preferred_element_type=jnp.float32) + bv_ref[...]

    for h in range(n_heads):
        lo = h * dp
        qh = q_all[:, :, lo:lo + dp].astype(jnp.bfloat16)
        kh = k_all[:, :, lo:lo + dp].astype(jnp.bfloat16)
        vh = v_all[:, :, lo:lo + dp].astype(jnp.bfloat16)

        # scores = q @ k^T per batch (contraction on the feature dim, no .T).
        scores = jnp.einsum('bqd,bkd->bqk', qh, kh,
                            preferred_element_type=jnp.float32)
        scores = scores - jnp.max(scores, axis=-1, keepdims=True)
        p = jnp.exp(scores)
        denom = jnp.sum(p, axis=-1, keepdims=True)

        # Deferred softmax normalization: scale the (Bt,S,Dp) output rather
        # than the (Bt,S,S) probabilities.  mask=None, dropout=identity.
        attn = jnp.einsum('bqk,bkd->bqd', p.astype(jnp.bfloat16), vh,
                          preferred_element_type=jnp.float32)
        attn = attn * pl.reciprocal(denom, approx=True)

        # Per-head output linear.
        out_h = jnp.einsum('bsd,dn->bsn', attn.astype(jnp.bfloat16), wo_ref[h],
                           preferred_element_type=jnp.float32) + bo_ref[h]
        out_ref[h] = out_h.astype(out_ref.dtype)


def _compose_linear_chain(w, b):
    """Collapse chained nn.Linear layers (y = x @ W[h].T + b[h], h = 0..i)
    into one affine map per head:  y_i = x @ A[i] + c[i]  (f32 math)."""
    n_heads, d, _ = w.shape
    a_list, c_list = [], []
    a = jnp.eye(d, dtype=jnp.float32)
    c = jnp.zeros((d,), jnp.float32)
    for h in range(n_heads):
        wt = w[h].astype(jnp.float32).T
        a = a @ wt
        c = c @ wt + b[h].astype(jnp.float32)
        a_list.append(a)
        c_list.append(c)
    return jnp.stack(a_list), jnp.stack(c_list)


def _pad_last(x, dp):
    d = x.shape[-1]
    if d == dp:
        return x
    pad = [(0, 0)] * (x.ndim - 1) + [(0, dp - d)]
    return jnp.pad(x, pad)


def _pad_last_two(w, dp):
    d = w.shape[-1]
    if d == dp:
        return w
    return jnp.pad(w, [(0, 0), (0, dp - d), (0, dp - d)])


def _vmem_capacity_bytes():
    """Per-core VMEM capacity for this generation (conservative fallback)."""
    try:
        info = pltpu.get_tpu_info()
        cap = getattr(info, "vmem_capacity_bytes", None)
        if cap:
            return int(cap)
    except Exception:
        pass
    return 64 * 1024 * 1024  # v7x-sized (smallest current generation)


def _pick_batch_block(batch, seq, dp, n_heads, vmem_budget):
    """Largest divisor of `batch` whose full per-step working set fits."""
    # Resident weights/biases (double-buffered by the pipeline by default).
    w_bytes = 2 * (3 * dp * n_heads * dp * 2      # wq/wk/wv  bf16
                   + n_heads * dp * dp * 2        # wo        bf16
                   + 3 * n_heads * dp * 4         # bq/bk/bv  f32
                   + n_heads * dp * 4)            # bo        f32
    best = 1
    for bt in range(1, batch + 1):
        if batch % bt:
            continue
        act_in = 3 * 2 * bt * seq * dp * 2            # bf16 q/k/v, 2-deep pipeline
        act_out = 2 * n_heads * bt * seq * dp * 2     # bf16 output, 2-deep pipeline
        interm = 3 * n_heads * bt * seq * dp * 4      # f32 projected q/k/v (all heads)
        interm += 2 * bt * seq * seq * 4              # f32 scores + exp(scores)
        interm += 2 * bt * seq * dp * 4               # f32 attn / per-head out
        if w_bytes + act_in + act_out + interm <= vmem_budget:
            best = bt
    return best


def multi_head_attention_pallas(q, k, v, wq, bq, wk, bk, wv, bv, wo, bo):
    """q,k,v: [B,S,D] f32.  w*: [H,D,D] in PyTorch [out,in] layout.  b*: [H,D].

    Returns a list of H arrays of shape [B, S, D] f32 (matching the PyTorch
    forward's list return)."""
    B, S, D = q.shape
    H = wq.shape[0]
    scale = 1.0 / math.sqrt(D)  # d_k == d_model in this module

    # (1) Pre-compose the cumulative per-head projections (heads become
    #     independent of each other, all reading the ORIGINAL q/k/v).
    #     Composition is done in f32; bf16 quantization happens once at the end.
    aq, cq = _compose_linear_chain(wq, bq)
    ak, ck = _compose_linear_chain(wk, bk)
    av, cv = _compose_linear_chain(wv, bv)
    aq = aq * scale
    cq = cq * scale
    woT = jnp.swapaxes(wo, -1, -2).astype(jnp.float32)

    # (2) Lane-dense padding of the model dim + head-concatenated packing.
    Dp = ((D + 127) // 128) * 128

    def pack_w(a):  # (H, D, D) -> (Dp, H*Dp) with column block h == head h
        a_p = _pad_last_two(a, Dp)
        return jnp.transpose(a_p, (1, 0, 2)).reshape(Dp, H * Dp).astype(jnp.bfloat16)

    def pack_b(c):  # (H, D) -> (1, H*Dp)
        return _pad_last(c, Dp).reshape(1, H * Dp).astype(jnp.float32)

    qb = _pad_last(q, Dp).astype(jnp.bfloat16)
    kb = _pad_last(k, Dp).astype(jnp.bfloat16)
    vb = _pad_last(v, Dp).astype(jnp.bfloat16)
    wq_p, wk_p, wv_p = pack_w(aq), pack_w(ak), pack_w(av)
    bq_p, bk_p, bv_p = pack_b(cq), pack_b(ck), pack_b(cv)
    wo_p = _pad_last_two(woT, Dp).astype(jnp.bfloat16)
    bo_p = _pad_last(bo.astype(jnp.float32), Dp).reshape(H, 1, Dp)

    # (3) Generation-aware batch blocking + explicit VMEM limit.
    vmem_budget = int(_vmem_capacity_bytes() * 0.8)
    Bt = _pick_batch_block(B, S, Dp, H, vmem_budget)

    qkv_spec = pl.BlockSpec((Bt, S, Dp), lambda b: (b, 0, 0))
    # Weight/bias block indices are constant over the (only) grid axis, so
    # these tiles are DMA'd once and stay resident across all batch steps.
    wproj_spec = pl.BlockSpec((Dp, H * Dp), lambda b: (0, 0))
    bproj_spec = pl.BlockSpec((1, H * Dp), lambda b: (0, 0))
    wo_spec = pl.BlockSpec((H, Dp, Dp), lambda b: (0, 0, 0))
    bo_spec = pl.BlockSpec((H, 1, Dp), lambda b: (0, 0, 0))
    out_spec = pl.BlockSpec((H, Bt, S, Dp), lambda b: (0, b, 0, 0))

    out = pl.pallas_call(
        _mha_kernel,
        out_shape=jax.ShapeDtypeStruct((H, B, S, Dp), jnp.bfloat16),
        grid_spec=pltpu.PrefetchScalarGridSpec(
            num_scalar_prefetch=0,
            grid=(B // Bt,),
            in_specs=[qkv_spec, qkv_spec, qkv_spec,
                      wproj_spec, wproj_spec, wproj_spec, wo_spec,
                      bproj_spec, bproj_spec, bproj_spec, bo_spec],
            out_specs=out_spec,
        ),
        compiler_params=pltpu.CompilerParams(
            dimension_semantics=("parallel",),
            vmem_limit_bytes=vmem_budget),
    )(qb, kb, vb, wq_p, wk_p, wv_p, wo_p, bq_p, bk_p, bv_p, bo_p)

    out = out[..., :D].astype(jnp.float32)
    return [out[i] for i in range(H)]


def multi_head_attention_ref(q, k, v, wq, bq, wk, bk, wv, bv, wo, bo):
    """Pure-JAX replica of the PyTorch forward (eval mode, mask=None)."""
    H = wq.shape[0]
    d_k = q.shape[-1]
    outs = []
    for i in range(H):
        k = k @ wk[i].T + bk[i]
        q = q @ wq[i].T + bq[i]
        v = v @ wv[i].T + bv[i]
        scores = (q @ jnp.swapaxes(k, -1, -2)) / math.sqrt(d_k)
        scores = jax.nn.softmax(scores, axis=-1)
        attn = scores @ v
        outs.append(attn @ wo[i].T + bo[i])
    return outs


if __name__ == "__main__":
    B, S, D, H = 2, 8, 32, 4  # batch, seq, d_model, heads

    key = jax.random.PRNGKey(0)
    keys = jax.random.split(key, 12)

    q = jax.random.normal(keys[0], (B, S, D), jnp.float32)
    k = jax.random.normal(keys[1], (B, S, D), jnp.float32)
    v = jax.random.normal(keys[2], (B, S, D), jnp.float32)

    # Deterministic "nn.Linear" parameters (PyTorch layout: W [out, in], b [out]).
    lim = 1.0 / math.sqrt(D)
    wq = jax.random.uniform(keys[3], (H, D, D), jnp.float32, -lim, lim)
    wk = jax.random.uniform(keys[4], (H, D, D), jnp.float32, -lim, lim)
    wv = jax.random.uniform(keys[5], (H, D, D), jnp.float32, -lim, lim)
    wo = jax.random.uniform(keys[6], (H, D, D), jnp.float32, -lim, lim)
    bq = jax.random.uniform(keys[7], (H, D), jnp.float32, -lim, lim)
    bk = jax.random.uniform(keys[8], (H, D), jnp.float32, -lim, lim)
    bv = jax.random.uniform(keys[9], (H, D), jnp.float32, -lim, lim)
    bo = jax.random.uniform(keys[10], (H, D), jnp.float32, -lim, lim)

    outs = multi_head_attention_pallas(q, k, v, wq, bq, wk, bk, wv, bv, wo, bo)
    outs = [jax.block_until_ready(o) for o in outs]

    refs = multi_head_attention_ref(q, k, v, wq, bq, wk, bk, wv, bv, wo, bo)

    # bf16 MXU operands + bf16 output + composed weights + approx reciprocal
    # -> tolerance at bf16 level.
    for got, want in zip(outs, refs):
        np.testing.assert_allclose(np.asarray(got), np.asarray(want),
                                   rtol=3e-2, atol=3e-2)
    print("KERNEL_OK")
</pallas_src>

<mosaic_0001>
module attributes {stable_mosaic.version = 11 : i64} {
  func.func @_mha_kernel(%arg0: i32, %arg1: memref<2x8x128xbf16, #tpu.memory_space<vmem>>, %arg2: memref<2x8x128xbf16, #tpu.memory_space<vmem>>, %arg3: memref<2x8x128xbf16, #tpu.memory_space<vmem>>, %arg4: memref<128x512xbf16, #tpu.memory_space<vmem>>, %arg5: memref<128x512xbf16, #tpu.memory_space<vmem>>, %arg6: memref<128x512xbf16, #tpu.memory_space<vmem>>, %arg7: memref<4x128x128xbf16, #tpu.memory_space<vmem>>, %arg8: memref<1x512xf32, #tpu.memory_space<vmem>>, %arg9: memref<1x512xf32, #tpu.memory_space<vmem>>, %arg10: memref<1x512xf32, #tpu.memory_space<vmem>>, %arg11: memref<4x1x128xf32, #tpu.memory_space<vmem>>, %arg12: memref<4x2x8x128xbf16, #tpu.memory_space<vmem>>) attributes {dimension_semantics = [#tpu.dimension_semantics<parallel>], iteration_bounds = array<i64: 1>, scalar_prefetch = 0 : i64, scratch_operands = 0 : i64, tpu.core_type = #tpu.core_type<tc>, window_params = [{transform_indices = @transform_0, window_bounds = array<i64: 2, 8, 128>}, {transform_indices = @transform_1, window_bounds = array<i64: 2, 8, 128>}, {transform_indices = @transform_2, window_bounds = array<i64: 2, 8, 128>}, {pipeline_mode = #tpu.pipeline_mode<synchronous>, transform_indices = @transform_3, window_bounds = array<i64: 128, 512>}, {pipeline_mode = #tpu.pipeline_mode<synchronous>, transform_indices = @transform_4, window_bounds = array<i64: 128, 512>}, {pipeline_mode = #tpu.pipeline_mode<synchronous>, transform_indices = @transform_5, window_bounds = array<i64: 128, 512>}, {pipeline_mode = #tpu.pipeline_mode<synchronous>, transform_indices = @transform_6, window_bounds = array<i64: 4, 128, 128>}, {pipeline_mode = #tpu.pipeline_mode<synchronous>, transform_indices = @transform_7, window_bounds = array<i64: 1, 512>}, {pipeline_mode = #tpu.pipeline_mode<synchronous>, transform_indices = @transform_8, window_bounds = array<i64: 1, 512>}, {pipeline_mode = #tpu.pipeline_mode<synchronous>, transform_indices = @transform_9, window_bounds = array<i64: 1, 512>}, {pipeline_mode = #tpu.pipeline_mode<synchronous>, transform_indices = @transform_10, window_bounds = array<i64: 4, 1, 128>}, {transform_indices = @transform_11, window_bounds = array<i64: 4, 2, 8, 128>}]} {
    %c0 = arith.constant 0 : index
    %c0_0 = arith.constant 0 : index
    %c0_1 = arith.constant 0 : index
    %0 = vector.load %arg1[%c0, %c0_0, %c0_1] : memref<2x8x128xbf16, #tpu.memory_space<vmem>>, vector<2x8x128xbf16>
    %c0_2 = arith.constant 0 : index
    %c0_3 = arith.constant 0 : index
    %1 = vector.load %arg4[%c0_2, %c0_3] : memref<128x512xbf16, #tpu.memory_space<vmem>>, vector<128x512xbf16>
    "tpu.trace_start"() <{level = 10 : i32, message = "bsd,dn->bsn"}> : () -> ()
    %cst = arith.constant dense<0.000000e+00> : vector<2x8x512xf32>
    %2 = tpu.matmul %0, %1, %cst {dimension_numbers = #tpu.dot_dimension_numbers<[2], [0], [0, 1], [1], [0, 0, 0, 1, 1, 1], [], []>} : vector<2x8x128xbf16>, vector<128x512xbf16>, vector<2x8x512xf32> -> vector<2x8x512xf32>
    "tpu.trace_stop"() : () -> ()
    %c0_4 = arith.constant 0 : index
    %c0_5 = arith.constant 0 : index
    %3 = vector.load %arg8[%c0_4, %c0_5] : memref<1x512xf32, #tpu.memory_space<vmem>>, vector<1x512xf32>
    %4 = vector.shape_cast %3 : vector<1x512xf32> to vector<1x1x512xf32>
    %5 = vector.broadcast %4 : vector<1x1x512xf32> to vector<2x8x512xf32>
    %6 = arith.addf %2, %5 : vector<2x8x512xf32>
    %c0_6 = arith.constant 0 : index
    %c0_7 = arith.constant 0 : index
    %c0_8 = arith.constant 0 : index
    %7 = vector.load %arg2[%c0_6, %c0_7, %c0_8] : memref<2x8x128xbf16, #tpu.memory_space<vmem>>, vector<2x8x128xbf16>
    %c0_9 = arith.constant 0 : index
    %c0_10 = arith.constant 0 : index
    %8 = vector.load %arg5[%c0_9, %c0_10] : memref<128x512xbf16, #tpu.memory_space<vmem>>, vector<128x512xbf16>
    "tpu.trace_start"() <{level = 10 : i32, message = "bsd,dn->bsn"}> : () -> ()
    %cst_11 = arith.constant dense<0.000000e+00> : vector<2x8x512xf32>
    %9 = tpu.matmul %7, %8, %cst_11 {dimension_numbers = #tpu.dot_dimension_numbers<[2], [0], [0, 1], [1], [0, 0, 0, 1, 1, 1], [], []>} : vector<2x8x128xbf16>, vector<128x512xbf16>, vector<2x8x512xf32> -> vector<2x8x512xf32>
    "tpu.trace_stop"() : () -> ()
    %c0_12 = arith.constant 0 : index
    %c0_13 = arith.constant 0 : index
    %10 = vector.load %arg9[%c0_12, %c0_13] : memref<1x512xf32, #tpu.memory_space<vmem>>, vector<1x512xf32>
    %11 = vector.shape_cast %10 : vector<1x512xf32> to vector<1x1x512xf32>
    %12 = vector.broadcast %11 : vector<1x1x512xf32> to vector<2x8x512xf32>
    %13 = arith.addf %9, %12 : vector<2x8x512xf32>
    %c0_14 = arith.constant 0 : index
    %c0_15 = arith.constant 0 : index
    %c0_16 = arith.constant 0 : index
    %14 = vector.load %arg3[%c0_14, %c0_15, %c0_16] : memref<2x8x128xbf16, #tpu.memory_space<vmem>>, vector<2x8x128xbf16>
    %c0_17 = arith.constant 0 : index
    %c0_18 = arith.constant 0 : index
    %15 = vector.load %arg6[%c0_17, %c0_18] : memref<128x512xbf16, #tpu.memory_space<vmem>>, vector<128x512xbf16>
    "tpu.trace_start"() <{level = 10 : i32, message = "bsd,dn->bsn"}> : () -> ()
    %cst_19 = arith.constant dense<0.000000e+00> : vector<2x8x512xf32>
    %16 = tpu.matmul %14, %15, %cst_19 {dimension_numbers = #tpu.dot_dimension_numbers<[2], [0], [0, 1], [1], [0, 0, 0, 1, 1, 1], [], []>} : vector<2x8x128xbf16>, vector<128x512xbf16>, vector<2x8x512xf32> -> vector<2x8x512xf32>
    "tpu.trace_stop"() : () -> ()
    %c0_20 = arith.constant 0 : index
    %c0_21 = arith.constant 0 : index
    %17 = vector.load %arg10[%c0_20, %c0_21] : memref<1x512xf32, #tpu.memory_space<vmem>>, vector<1x512xf32>
    %18 = vector.shape_cast %17 : vector<1x512xf32> to vector<1x1x512xf32>
    %19 = vector.broadcast %18 : vector<1x1x512xf32> to vector<2x8x512xf32>
    %20 = arith.addf %16, %19 : vector<2x8x512xf32>
    %21 = vector.extract_strided_slice %6 {offsets = [0, 0, 0], sizes = [2, 8, 128], strides = [1, 1, 1]} : vector<2x8x512xf32> to vector<2x8x128xf32>
    %22 = arith.truncf %21 : vector<2x8x128xf32> to vector<2x8x128xbf16>
    %23 = vector.extract_strided_slice %13 {offsets = [0, 0, 0], sizes = [2, 8, 128], strides = [1, 1, 1]} : vector<2x8x512xf32> to vector<2x8x128xf32>
    %24 = arith.truncf %23 : vector<2x8x128xf32> to vector<2x8x128xbf16>
    %25 = vector.extract_strided_slice %20 {offsets = [0, 0, 0], sizes = [2, 8, 128], strides = [1, 1, 1]} : vector<2x8x512xf32> to vector<2x8x128xf32>
    %26 = arith.truncf %25 : vector<2x8x128xf32> to vector<2x8x128xbf16>
    "tpu.trace_start"() <{level = 10 : i32, message = "bqd,bkd->bqk"}> : () -> ()
    %cst_22 = arith.constant dense<0.000000e+00> : vector<2x8x8xf32>
    %27 = tpu.matmul %22, %24, %cst_22 {dimension_numbers = #tpu.dot_dimension_numbers<[2], [2], [1], [1], [0, 0, 0, 1, 1, 1], [0], [0]>} : vector<2x8x128xbf16>, vector<2x8x128xbf16>, vector<2x8x8xf32> -> vector<2x8x8xf32>
    "tpu.trace_stop"() : () -> ()
    %cst_23 = arith.constant dense<0xFF800000> : vector<2x8xf32>
    %28 = vector.multi_reduction <maximumf>, %27, %cst_23 [2] : vector<2x8x8xf32> to vector<2x8xf32>
    %29 = vector.shape_cast %28 : vector<2x8xf32> to vector<2x8x1xf32>
    %30 = vector.broadcast %29 : vector<2x8x1xf32> to vector<2x8x8xf32>
    %31 = arith.subf %27, %30 : vector<2x8x8xf32>
    %32 = math.exp %31 : vector<2x8x8xf32>
    %cst_24 = arith.constant dense<0.000000e+00> : vector<2x8xf32>
    %33 = vector.multi_reduction <add>, %32, %cst_24 [2] : vector<2x8x8xf32> to vector<2x8xf32>
    %34 = vector.shape_cast %33 : vector<2x8xf32> to vector<2x8x1xf32>
    %35 = arith.truncf %32 : vector<2x8x8xf32> to vector<2x8x8xbf16>
    "tpu.trace_start"() <{level = 10 : i32, message = "bqk,bkd->bqd"}> : () -> ()
    %cst_25 = arith.constant dense<0.000000e+00> : vector<2x8x128xf32>
    %36 = tpu.matmul %35, %26, %cst_25 {dimension_numbers = #tpu.dot_dimension_numbers<[2], [1], [1], [2], [0, 0, 0, 1, 1, 2], [0], [0]>} : vector<2x8x8xbf16>, vector<2x8x128xbf16>, vector<2x8x128xf32> -> vector<2x8x128xf32>
    "tpu.trace_stop"() : () -> ()
    %37 = tpu.reciprocal %34 {approx = true} : vector<2x8x1xf32> -> vector<2x8x1xf32>
    %38 = vector.broadcast %37 : vector<2x8x1xf32> to vector<2x8x128xf32>
    %39 = arith.mulf %36, %38 : vector<2x8x128xf32>
    %40 = arith.truncf %39 : vector<2x8x128xf32> to vector<2x8x128xbf16>
    %c0_26 = arith.constant 0 : index
    %c0_27 = arith.constant 0 : index
    %c0_28 = arith.constant 0 : index
    %41 = vector.load %arg7[%c0_26, %c0_27, %c0_28] : memref<4x128x128xbf16, #tpu.memory_space<vmem>>, vector<1x128x128xbf16>
    %42 = vector.shape_cast %41 : vector<1x128x128xbf16> to vector<128x128xbf16>
    "tpu.trace_start"() <{level = 10 : i32, message = "bsd,dn->bsn"}> : () -> ()
    %cst_29 = arith.constant dense<0.000000e+00> : vector<2x8x128xf32>
    %43 = tpu.matmul %40, %42, %cst_29 {dimension_numbers = #tpu.dot_dimension_numbers<[2], [0], [0, 1], [1], [0, 0, 0, 1, 1, 1], [], []>} : vector<2x8x128xbf16>, vector<128x128xbf16>, vector<2x8x128xf32> -> vector<2x8x128xf32>
    "tpu.trace_stop"() : () -> ()
    %c0_30 = arith.constant 0 : index
    %c0_31 = arith.constant 0 : index
    %c0_32 = arith.constant 0 : index
    %44 = vector.load %arg11[%c0_30, %c0_31, %c0_32] : memref<4x1x128xf32, #tpu.memory_space<vmem>>, vector<1x1x128xf32>
    %45 = vector.shape_cast %44 : vector<1x1x128xf32> to vector<1x128xf32>
    %46 = vector.shape_cast %45 : vector<1x128xf32> to vector<1x1x128xf32>
    %47 = vector.broadcast %46 : vector<1x1x128xf32> to vector<2x8x128xf32>
    %48 = arith.addf %43, %47 : vector<2x8x128xf32>
    %49 = arith.truncf %48 : vector<2x8x128xf32> to vector<2x8x128xbf16>
    %c0_33 = arith.constant 0 : index
    %c0_34 = arith.constant 0 : index
    %c0_35 = arith.constant 0 : index
    %c0_36 = arith.constant 0 : index
    %50 = vector.load %arg12[%c0_33, %c0_34, %c0_35, %c0_36] : memref<4x2x8x128xbf16, #tpu.memory_space<vmem>>, vector<1x2x8x128xbf16>
    %51 = vector.shape_cast %50 : vector<1x2x8x128xbf16> to vector<2x8x128xbf16>
    %52 = vector.shape_cast %49 : vector<2x8x128xbf16> to vector<1x2x8x128xbf16>
    tpu.vector_store %arg12[%c0_33, %c0_34, %c0_35, %c0_36], %52 {strides = array<i32>} : memref<4x2x8x128xbf16, #tpu.memory_space<vmem>>, vector<1x2x8x128xbf16>,
    %53 = vector.extract_strided_slice %6 {offsets = [0, 0, 128], sizes = [2, 8, 128], strides = [1, 1, 1]} : vector<2x8x512xf32> to vector<2x8x128xf32>
    %54 = arith.truncf %53 : vector<2x8x128xf32> to vector<2x8x128xbf16>
    %55 = vector.extract_strided_slice %13 {offsets = [0, 0, 128], sizes = [2, 8, 128], strides = [1, 1, 1]} : vector<2x8x512xf32> to vector<2x8x128xf32>
    %56 = arith.truncf %55 : vector<2x8x128xf32> to vector<2x8x128xbf16>
    %57 = vector.extract_strided_slice %20 {offsets = [0, 0, 128], sizes = [2, 8, 128], strides = [1, 1, 1]} : vector<2x8x512xf32> to vector<2x8x128xf32>
    %58 = arith.truncf %57 : vector<2x8x128xf32> to vector<2x8x128xbf16>
    "tpu.trace_start"() <{level = 10 : i32, message = "bqd,bkd->bqk"}> : () -> ()
    %cst_37 = arith.constant dense<0.000000e+00> : vector<2x8x8xf32>
    %59 = tpu.matmul %54, %56, %cst_37 {dimension_numbers = #tpu.dot_dimension_numbers<[2], [2], [1], [1], [0, 0, 0, 1, 1, 1], [0], [0]>} : vector<2x8x128xbf16>, vector<2x8x128xbf16>, vector<2x8x8xf32> -> vector<2x8x8xf32>
    "tpu.trace_stop"() : () -> ()
    %cst_38 = arith.constant dense<0xFF800000> : vector<2x8xf32>
    %60 = vector.multi_reduction <maximumf>, %59, %cst_38 [2] : vector<2x8x8xf32> to vector<2x8xf32>
    %61 = vector.shape_cast %60 : vector<2x8xf32> to vector<2x8x1xf32>
    %62 = vector.broadcast %61 : vector<2x8x1xf32> to vector<2x8x8xf32>
    %63 = arith.subf %59, %62 : vector<2x8x8xf32>
    %64 = math.exp %63 : vector<2x8x8xf32>
    %cst_39 = arith.constant dense<0.000000e+00> : vector<2x8xf32>
    %65 = vector.multi_reduction <add>, %64, %cst_39 [2] : vector<2x8x8xf32> to vector<2x8xf32>
    %66 = vector.shape_cast %65 : vector<2x8xf32> to vector<2x8x1xf32>
    %67 = arith.truncf %64 : vector<2x8x8xf32> to vector<2x8x8xbf16>
    "tpu.trace_start"() <{level = 10 : i32, message = "bqk,bkd->bqd"}> : () -> ()
    %cst_40 = arith.constant dense<0.000000e+00> : vector<2x8x128xf32>
    %68 = tpu.matmul %67, %58, %cst_40 {dimension_numbers = #tpu.dot_dimension_numbers<[2], [1], [1], [2], [0, 0, 0, 1, 1, 2], [0], [0]>} : vector<2x8x8xbf16>, vector<2x8x128xbf16>, vector<2x8x128xf32> -> vector<2x8x128xf32>
    "tpu.trace_stop"() : () -> ()
    %69 = tpu.reciprocal %66 {approx = true} : vector<2x8x1xf32> -> vector<2x8x1xf32>
    %70 = vector.broadcast %69 : vector<2x8x1xf32> to vector<2x8x128xf32>
    %71 = arith.mulf %68, %70 : vector<2x8x128xf32>
    %72 = arith.truncf %71 : vector<2x8x128xf32> to vector<2x8x128xbf16>
    %c1 = arith.constant 1 : index
    %c0_41 = arith.constant 0 : index
    %c0_42 = arith.constant 0 : index
    %73 = vector.load %arg7[%c1, %c0_41, %c0_42] : memref<4x128x128xbf16, #tpu.memory_space<vmem>>, vector<1x128x128xbf16>
    %74 = vector.shape_cast %73 : vector<1x128x128xbf16> to vector<128x128xbf16>
    "tpu.trace_start"() <{level = 10 : i32, message = "bsd,dn->bsn"}> : () -> ()
    %cst_43 = arith.constant dense<0.000000e+00> : vector<2x8x128xf32>
    %75 = tpu.matmul %72, %74, %cst_43 {dimension_numbers = #tpu.dot_dimension_numbers<[2], [0], [0, 1], [1], [0, 0, 0, 1, 1, 1], [], []>} : vector<2x8x128xbf16>, vector<128x128xbf16>, vector<2x8x128xf32> -> vector<2x8x128xf32>
    "tpu.trace_stop"() : () -> ()
    %c1_44 = arith.constant 1 : index
    %c0_45 = arith.constant 0 : index
    %c0_46 = arith.constant 0 : index
    %76 = vector.load %arg11[%c1_44, %c0_45, %c0_46] : memref<4x1x128xf32, #tpu.memory_space<vmem>>, vector<1x1x128xf32>
    %77 = vector.shape_cast %76 : vector<1x1x128xf32> to vector<1x128xf32>
    %78 = vector.shape_cast %77 : vector<1x128xf32> to vector<1x1x128xf32>
    %79 = vector.broadcast %78 : vector<1x1x128xf32> to vector<2x8x128xf32>
    %80 = arith.addf %75, %79 : vector<2x8x128xf32>
    %81 = arith.truncf %80 : vector<2x8x128xf32> to vector<2x8x128xbf16>
    %c1_47 = arith.constant 1 : index
    %c0_48 = arith.constant 0 : index
    %c0_49 = arith.constant 0 : index
    %c0_50 = arith.constant 0 : index
    %82 = vector.load %arg12[%c1_47, %c0_48, %c0_49, %c0_50] : memref<4x2x8x128xbf16, #tpu.memory_space<vmem>>, vector<1x2x8x128xbf16>
    %83 = vector.shape_cast %82 : vector<1x2x8x128xbf16> to vector<2x8x128xbf16>
    %84 = vector.shape_cast %81 : vector<2x8x128xbf16> to vector<1x2x8x128xbf16>
    tpu.vector_store %arg12[%c1_47, %c0_48, %c0_49, %c0_50], %84 {strides = array<i32>} : memref<4x2x8x128xbf16, #tpu.memory_space<vmem>>, vector<1x2x8x128xbf16>,
    %85 = vector.extract_strided_slice %6 {offsets = [0, 0, 256], sizes = [2, 8, 128], strides = [1, 1, 1]} : vector<2x8x512xf32> to vector<2x8x128xf32>
    %86 = arith.truncf %85 : vector<2x8x128xf32> to vector<2x8x128xbf16>
    %87 = vector.extract_strided_slice %13 {offsets = [0, 0, 256], sizes = [2, 8, 128], strides = [1, 1, 1]} : vector<2x8x512xf32> to vector<2x8x128xf32>
    %88 = arith.truncf %87 : vector<2x8x128xf32> to vector<2x8x128xbf16>
    %89 = vector.extract_strided_slice %20 {offsets = [0, 0, 256], sizes = [2, 8, 128], strides = [1, 1, 1]} : vector<2x8x512xf32> to vector<2x8x128xf32>
    %90 = arith.truncf %89 : vector<2x8x128xf32> to vector<2x8x128xbf16>
    "tpu.trace_start"() <{level = 10 : i32, message = "bqd,bkd->bqk"}> : () -> ()
    %cst_51 = arith.constant dense<0.000000e+00> : vector<2x8x8xf32>
    %91 = tpu.matmul %86, %88, %cst_51 {dimension_numbers = #tpu.dot_dimension_numbers<[2], [2], [1], [1], [0, 0, 0, 1, 1, 1], [0], [0]>} : vector<2x8x128xbf16>, vector<2x8x128xbf16>, vector<2x8x8xf32> -> vector<2x8x8xf32>
    "tpu.trace_stop"() : () -> ()
    %cst_52 = arith.constant dense<0xFF800000> : vector<2x8xf32>
    %92 = vector.multi_reduction <maximumf>, %91, %cst_52 [2] : vector<2x8x8xf32> to vector<2x8xf32>
    %93 = vector.shape_cast %92 : vector<2x8xf32> to vector<2x8x1xf32>
    %94 = vector.broadcast %93 : vector<2x8x1xf32> to vector<2x8x8xf32>
    %95 = arith.subf %91, %94 : vector<2x8x8xf32>
    %96 = math.exp %95 : vector<2x8x8xf32>
    %cst_53 = arith.constant dense<0.000000e+00> : vector<2x8xf32>
    %97 = vector.multi_reduction <add>, %96, %cst_53 [2] : vector<2x8x8xf32> to vector<2x8xf32>
    %98 = vector.shape_cast %97 : vector<2x8xf32> to vector<2x8x1xf32>
    %99 = arith.truncf %96 : vector<2x8x8xf32> to vector<2x8x8xbf16>
    "tpu.trace_start"() <{level = 10 : i32, message = "bqk,bkd->bqd"}> : () -> ()
    %cst_54 = arith.constant dense<0.000000e+00> : vector<2x8x128xf32>
    %100 = tpu.matmul %99, %90, %cst_54 {dimension_numbers = #tpu.dot_dimension_numbers<[2], [1], [1], [2], [0, 0, 0, 1, 1, 2], [0], [0]>} : vector<2x8x8xbf16>, vector<2x8x128xbf16>, vector<2x8x128xf32> -> vector<2x8x128xf32>
    "tpu.trace_stop"() : () -> ()
    %101 = tpu.reciprocal %98 {approx = true} : vector<2x8x1xf32> -> vector<2x8x1xf32>
    %102 = vector.broadcast %101 : vector<2x8x1xf32> to vector<2x8x128xf32>
    %103 = arith.mulf %100, %102 : vector<2x8x128xf32>
    %104 = arith.truncf %103 : vector<2x8x128xf32> to vector<2x8x128xbf16>
    %c2 = arith.constant 2 : index
    %c0_55 = arith.constant 0 : index
    %c0_56 = arith.constant 0 : index
    %105 = vector.load %arg7[%c2, %c0_55, %c0_56] : memref<4x128x128xbf16, #tpu.memory_space<vmem>>, vector<1x128x128xbf16>
    %106 = vector.shape_cast %105 : vector<1x128x128xbf16> to vector<128x128xbf16>
    "tpu.trace_start"() <{level = 10 : i32, message = "bsd,dn->bsn"}> : () -> ()
    %cst_57 = arith.constant dense<0.000000e+00> : vector<2x8x128xf32>
    %107 = tpu.matmul %104, %106, %cst_57 {dimension_numbers = #tpu.dot_dimension_numbers<[2], [0], [0, 1], [1], [0, 0, 0, 1, 1, 1], [], []>} : vector<2x8x128xbf16>, vector<128x128xbf16>, vector<2x8x128xf32> -> vector<2x8x128xf32>
    "tpu.trace_stop"() : () -> ()
    %c2_58 = arith.constant 2 : index
    %c0_59 = arith.constant 0 : index
    %c0_60 = arith.constant 0 : index
    %108 = vector.load %arg11[%c2_58, %c0_59, %c0_60] : memref<4x1x128xf32, #tpu.memory_space<vmem>>, vector<1x1x128xf32>
    %109 = vector.shape_cast %108 : vector<1x1x128xf32> to vector<1x128xf32>
    %110 = vector.shape_cast %109 : vector<1x128xf32> to vector<1x1x128xf32>
    %111 = vector.broadcast %110 : vector<1x1x128xf32> to vector<2x8x128xf32>
    %112 = arith.addf %107, %111 : vector<2x8x128xf32>
    %113 = arith.truncf %112 : vector<2x8x128xf32> to vector<2x8x128xbf16>
    %c2_61 = arith.constant 2 : index
    %c0_62 = arith.constant 0 : index
    %c0_63 = arith.constant 0 : index
    %c0_64 = arith.constant 0 : index
    %114 = vector.load %arg12[%c2_61, %c0_62, %c0_63, %c0_64] : memref<4x2x8x128xbf16, #tpu.memory_space<vmem>>, vector<1x2x8x128xbf16>
    %115 = vector.shape_cast %114 : vector<1x2x8x128xbf16> to vector<2x8x128xbf16>
    %116 = vector.shape_cast %113 : vector<2x8x128xbf16> to vector<1x2x8x128xbf16>
    tpu.vector_store %arg12[%c2_61, %c0_62, %c0_63, %c0_64], %116 {strides = array<i32>} : memref<4x2x8x128xbf16, #tpu.memory_space<vmem>>, vector<1x2x8x128xbf16>,
    %117 = vector.extract_strided_slice %6 {offsets = [0, 0, 384], sizes = [2, 8, 128], strides = [1, 1, 1]} : vector<2x8x512xf32> to vector<2x8x128xf32>
    %118 = arith.truncf %117 : vector<2x8x128xf32> to vector<2x8x128xbf16>
    %119 = vector.extract_strided_slice %13 {offsets = [0, 0, 384], sizes = [2, 8, 128], strides = [1, 1, 1]} : vector<2x8x512xf32> to vector<2x8x128xf32>
    %120 = arith.truncf %119 : vector<2x8x128xf32> to vector<2x8x128xbf16>
    %121 = vector.extract_strided_slice %20 {offsets = [0, 0, 384], sizes = [2, 8, 128], strides = [1, 1, 1]} : vector<2x8x512xf32> to vector<2x8x128xf32>
    %122 = arith.truncf %121 : vector<2x8x128xf32> to vector<2x8x128xbf16>
    "tpu.trace_start"() <{level = 10 : i32, message = "bqd,bkd->bqk"}> : () -> ()
    %cst_65 = arith.constant dense<0.000000e+00> : vector<2x8x8xf32>
    %123 = tpu.matmul %118, %120, %cst_65 {dimension_numbers = #tpu.dot_dimension_numbers<[2], [2], [1], [1], [0, 0, 0, 1, 1, 1], [0], [0]>} : vector<2x8x128xbf16>, vector<2x8x128xbf16>, vector<2x8x8xf32> -> vector<2x8x8xf32>
    "tpu.trace_stop"() : () -> ()
    %cst_66 = arith.constant dense<0xFF800000> : vector<2x8xf32>
    %124 = vector.multi_reduction <maximumf>, %123, %cst_66 [2] : vector<2x8x8xf32> to vector<2x8xf32>
    %125 = vector.shape_cast %124 : vector<2x8xf32> to vector<2x8x1xf32>
    %126 = vector.broadcast %125 : vector<2x8x1xf32> to vector<2x8x8xf32>
    %127 = arith.subf %123, %126 : vector<2x8x8xf32>
    %128 = math.exp %127 : vector<2x8x8xf32>
    %cst_67 = arith.constant dense<0.000000e+00> : vector<2x8xf32>
    %129 = vector.multi_reduction <add>, %128, %cst_67 [2] : vector<2x8x8xf32> to vector<2x8xf32>
    %130 = vector.shape_cast %129 : vector<2x8xf32> to vector<2x8x1xf32>
    %131 = arith.truncf %128 : vector<2x8x8xf32> to vector<2x8x8xbf16>
    "tpu.trace_start"() <{level = 10 : i32, message = "bqk,bkd->bqd"}> : () -> ()
    %cst_68 = arith.constant dense<0.000000e+00> : vector<2x8x128xf32>
    %132 = tpu.matmul %131, %122, %cst_68 {dimension_numbers = #tpu.dot_dimension_numbers<[2], [1], [1], [2], [0, 0, 0, 1, 1, 2], [0], [0]>} : vector<2x8x8xbf16>, vector<2x8x128xbf16>, vector<2x8x128xf32> -> vector<2x8x128xf32>
    "tpu.trace_stop"() : () -> ()
    %133 = tpu.reciprocal %130 {approx = true} : vector<2x8x1xf32> -> vector<2x8x1xf32>
    %134 = vector.broadcast %133 : vector<2x8x1xf32> to vector<2x8x128xf32>
    %135 = arith.mulf %132, %134 : vector<2x8x128xf32>
    %136 = arith.truncf %135 : vector<2x8x128xf32> to vector<2x8x128xbf16>
    %c3 = arith.constant 3 : index
    %c0_69 = arith.constant 0 : index
    %c0_70 = arith.constant 0 : index
    %137 = vector.load %arg7[%c3, %c0_69, %c0_70] : memref<4x128x128xbf16, #tpu.memory_space<vmem>>, vector<1x128x128xbf16>
    %138 = vector.shape_cast %137 : vector<1x128x128xbf16> to vector<128x128xbf16>
    "tpu.trace_start"() <{level = 10 : i32, message = "bsd,dn->bsn"}> : () -> ()
    %cst_71 = arith.constant dense<0.000000e+00> : vector<2x8x128xf32>
    %139 = tpu.matmul %136, %138, %cst_71 {dimension_numbers = #tpu.dot_dimension_numbers<[2], [0], [0, 1], [1], [0, 0, 0, 1, 1, 1], [], []>} : vector<2x8x128xbf16>, vector<128x128xbf16>, vector<2x8x128xf32> -> vector<2x8x128xf32>
    "tpu.trace_stop"() : () -> ()
    %c3_72 = arith.constant 3 : index
    %c0_73 = arith.constant 0 : index
    %c0_74 = arith.constant 0 : index
    %140 = vector.load %arg11[%c3_72, %c0_73, %c0_74] : memref<4x1x128xf32, #tpu.memory_space<vmem>>, vector<1x1x128xf32>
    %141 = vector.shape_cast %140 : vector<1x1x128xf32> to vector<1x128xf32>
    %142 = vector.shape_cast %141 : vector<1x128xf32> to vector<1x1x128xf32>
    %143 = vector.broadcast %142 : vector<1x1x128xf32> to vector<2x8x128xf32>
    %144 = arith.addf %139, %143 : vector<2x8x128xf32>
    %145 = arith.truncf %144 : vector<2x8x128xf32> to vector<2x8x128xbf16>
    %c3_75 = arith.constant 3 : index
    %c0_76 = arith.constant 0 : index
    %c0_77 = arith.constant 0 : index
    %c0_78 = arith.constant 0 : index
    %146 = vector.load %arg12[%c3_75, %c0_76, %c0_77, %c0_78] : memref<4x2x8x128xbf16, #tpu.memory_space<vmem>>, vector<1x2x8x128xbf16>
    %147 = vector.shape_cast %146 : vector<1x2x8x128xbf16> to vector<2x8x128xbf16>
    %148 = vector.shape_cast %145 : vector<2x8x128xbf16> to vector<1x2x8x128xbf16>
    tpu.vector_store %arg12[%c3_75, %c0_76, %c0_77, %c0_78], %148 {strides = array<i32>} : memref<4x2x8x128xbf16, #tpu.memory_space<vmem>>, vector<1x2x8x128xbf16>,
    return
  }
  func.func @transform_0(%arg0: i32) -> (i32, i32, i32) {
    %c0_i32 = arith.constant 0 : i32
    %c0_i32_0 = arith.constant 0 : i32
    %c0_i32_1 = arith.constant 0 : i32
    return %arg0, %c0_i32, %c0_i32_0 : i32, i32, i32
  }
  func.func @transform_1(%arg0: i32) -> (i32, i32, i32) {
    %c0_i32 = arith.constant 0 : i32
    %c0_i32_0 = arith.constant 0 : i32
    %c0_i32_1 = arith.constant 0 : i32
    return %arg0, %c0_i32, %c0_i32_0 : i32, i32, i32
  }
  func.func @transform_2(%arg0: i32) -> (i32, i32, i32) {
    %c0_i32 = arith.constant 0 : i32
    %c0_i32_0 = arith.constant 0 : i32
    %c0_i32_1 = arith.constant 0 : i32
    return %arg0, %c0_i32, %c0_i32_0 : i32, i32, i32
  }
  func.func @transform_3(%arg0: i32) -> (i32, i32) {
    %c0_i32 = arith.constant 0 : i32
    %c0_i32_0 = arith.constant 0 : i32
    %c0_i32_1 = arith.constant 0 : i32
    return %c0_i32, %c0_i32_0 : i32, i32
  }
  func.func @transform_4(%arg0: i32) -> (i32, i32) {
    %c0_i32 = arith.constant 0 : i32
    %c0_i32_0 = arith.constant 0 : i32
    %c0_i32_1 = arith.constant 0 : i32
    return %c0_i32, %c0_i32_0 : i32, i32
  }
  func.func @transform_5(%arg0: i32) -> (i32, i32) {
    %c0_i32 = arith.constant 0 : i32
    %c0_i32_0 = arith.constant 0 : i32
    %c0_i32_1 = arith.constant 0 : i32
    return %c0_i32, %c0_i32_0 : i32, i32
  }
  func.func @transform_6(%arg0: i32) -> (i32, i32, i32) {
    %c0_i32 = arith.constant 0 : i32
    %c0_i32_0 = arith.constant 0 : i32
    %c0_i32_1 = arith.constant 0 : i32
    %c0_i32_2 = arith.constant 0 : i32
    return %c0_i32, %c0_i32_0, %c0_i32_1 : i32, i32, i32
  }
  func.func @transform_7(%arg0: i32) -> (i32, i32) {
    %c0_i32 = arith.constant 0 : i32
    %c0_i32_0 = arith.constant 0 : i32
    %c0_i32_1 = arith.constant 0 : i32
    return %c0_i32, %c0_i32_0 : i32, i32
  }
  func.func @transform_8(%arg0: i32) -> (i32, i32) {
    %c0_i32 = arith.constant 0 : i32
    %c0_i32_0 = arith.constant 0 : i32
    %c0_i32_1 = arith.constant 0 : i32
    return %c0_i32, %c0_i32_0 : i32, i32
  }
  func.func @transform_9(%arg0: i32) -> (i32, i32) {
    %c0_i32 = arith.constant 0 : i32
    %c0_i32_0 = arith.constant 0 : i32
    %c0_i32_1 = arith.constant 0 : i32
    return %c0_i32, %c0_i32_0 : i32, i32
  }
  func.func @transform_10(%arg0: i32) -> (i32, i32, i32) {
    %c0_i32 = arith.constant 0 : i32
    %c0_i32_0 = arith.constant 0 : i32
    %c0_i32_1 = arith.constant 0 : i32
    %c0_i32_2 = arith.constant 0 : i32
    return %c0_i32, %c0_i32_0, %c0_i32_1 : i32, i32, i32
  }
  func.func @transform_11(%arg0: i32) -> (i32, i32, i32, i32) {
    %c0_i32 = arith.constant 0 : i32
    %c0_i32_0 = arith.constant 0 : i32
    %c0_i32_1 = arith.constant 0 : i32
    %c0_i32_2 = arith.constant 0 : i32
    return %c0_i32, %arg0, %c0_i32_0, %c0_i32_1 : i32, i32, i32, i32
  }
}

</mosaic_0001>

<bundles_post_ra>
// kernel: tpu_custom_call.1
= control target key start
LH: loop header
LB: loop body
LE: loop exit
PB: predicated region body
PF: predicated region fallthrough
CT: control target
= control target key end

     0   :  { %16 = vsyncpa [#allocation3], 0  ;;  %s3724_s0 = inlined_call_operand.hbm [shape: bf16[2,8,128], index: 0, kind: input, shape index: {}]   ;;  %s3725_s1 = inlined_call_operand.hbm [shape: bf16[2,8,128], index: 1, kind: input, shape index: {}]   ;;  %s3726_s2 = inlined_call_operand.hbm [shape: bf16[2,8,128], index: 2, kind: input, shape index: {}]   ;;  %s3727_s3 = inlined_call_operand.hbm [shape: bf16[128,512], index: 3, kind: input, shape index: {}]   ;;  %s3728_s4 = inlined_call_operand.hbm [shape: bf16[128,512], index: 4, kind: input, shape index: {}]   ;;  %s3729_s5 = inlined_call_operand.hbm [shape: bf16[128,512], index: 5, kind: input, shape index: {}]   ;;  %s3730_s6 = inlined_call_operand.hbm [shape: bf16[4,128,128], index: 6, kind: input, shape index: {}]   ;;  %s3731_s7 = inlined_call_operand.vmem [shape: f32[1,512], index: 7, kind: input, shape index: {}]   ;;  %s3732_s8 = inlined_call_operand.vmem [shape: f32[1,512], index: 8, kind: input, shape index: {}]   ;;  %s3733_s9 = inlined_call_operand.vmem [shape: f32[1,512], index: 9, kind: input, shape index: {}]   ;;  %s3734_s10 = inlined_call_operand.vmem [shape: f32[4,1,128], index: 10, kind: input, shape index: {}]   ;;  %s3735_s11 = inlined_call_operand.hbm [shape: bf16[4,2,8,128], index: 11, kind: output, shape index: {}]  }
   0x1   :  { %17 = vsyncpa [#allocation6], 0 }
   0x2   :  { %18 = vsyncpa [#allocation9], 0 }
   0x3   :  { %19 = vsyncpa [#allocation12], 0 }
   0x4   :  { %20 = vsyncpa [#allocation4], 0  ;;  %s3224_s17 = smov [#allocation5]   ;;  %s3225_s19 = smov [#allocation8]  }
   0x5   :  { %s38_s18 = sshll.u32 %s3224_s17, 4  ;;  %s62_s20 = sshll.u32 %s3225_s19, 4  ;;  %s39_s18 = int_to_ptr.vmem [resolvable:$true] %s38_s18  ;;  %s3299_s20 = int_to_ptr.vmem [resolvable:$true] %s62_s20 }
   0x6   :  { %s3038_s23 = scalar_lea.hbm %s3725_s1, 128 }
   0x7   :  { %p3039_p0 = scmp.ne.s32.totalorder %s3725_s1, %s3038_s23  ;;  %p3042_p1 = scmp.lt.u32.totalorder %s3038_s23, %s3725_s1 }
   0x9   :  { %p3044_p2 = pnand %p3042_p1, %p3039_p0 }
   0xb   :  { %3047 = shalt.err (!%p3044_p2)
}
   0xc   :  { %s3048_s28 = scalar_lea.vmem %s39_s18, 128  ;;  %p3053_p4 = scmp.lt.s32.totalorder %s39_s18, %s39_s18 }
   0xd   :  { %p3049_p3 = scmp.ne.s32.totalorder %s39_s18, %s3048_s28  ;;  %p3054_p5 = scmp.lt.s32.totalorder %s3048_s28, %s3048_s28 }
   0xf   :  { %p3055_p6 = por %p3054_p5, %p3053_p4 }
  0x11   :  { %p3056_p7 = pnand %p3055_p6, %p3049_p3 }
  0x13   :  { %3059 = shalt.err (!%p3056_p7)
}
  0x14   :  { %s3226_s29 = smov 64   ;;  %s3227_s30 = smov 4  }
  0x15   :  { %44 = dma.hbm_to_vmem [thread:$0]  %s3725_s1, 128, %s39_s18, [#allocation6], %s3226_s29, %s3226_s29, %s3227_s30  }
  0x16   :  { %s3060_s16 = scalar_lea.hbm %s3727_s3, 4096 }
  0x17   :  { %p3061_p8 = scmp.ne.s32.totalorder %s3727_s3, %s3060_s16  ;;  %p3064_p9 = scmp.lt.u32.totalorder %s3060_s16, %s3727_s3 }
  0x19   :  { %p3066_p10 = pnand %p3064_p9, %p3061_p8 }
  0x1b   :  { %3069 = shalt.err (!%p3066_p10)
}
  0x1c   :  { %s3070_s23 = scalar_lea.vmem %s3299_s20, 4096  ;;  %p3075_p12 = scmp.lt.s32.totalorder %s3299_s20, %s3299_s20 }
  0x1d   :  { %p3071_p11 = scmp.ne.s32.totalorder %s3299_s20, %s3070_s23  ;;  %p3076_p13 = scmp.lt.s32.totalorder %s3070_s23, %s3070_s23 }
  0x1f   :  { %p3077_p0 = por %p3076_p13, %p3075_p12 }
  0x21   :  { %p3078_p1 = pnand %p3077_p0, %p3071_p11 }
  0x23   :  { %3081 = shalt.err (!%p3078_p1)
}
  0x24   :  { %s3228_s1 = smov 256   ;;  %s3229_s18 = smov 16  }
  0x25   :  { %68 = dma.hbm_to_vmem [thread:$0]  %s3727_s3, 4096, %s3299_s20, [#allocation9], %s3228_s1, %s3228_s1, %s3229_s18  }
  0x26   :  { %s3230_s26 = smov [#allocation11]   ;;  %s3231_s28 = smov [#allocation2]  }
  0x27   :  { %s86_s27 = sshll.u32 %s3230_s26, 4  ;;  %s26_s12 = sshll.u32 %s3231_s28, 4  ;;  %s87_s27 = int_to_ptr.vmem [resolvable:$true] %s86_s27  ;;  %s3336_s12 = int_to_ptr.vmem [resolvable:$true] %s26_s12 }
  0x28   :  { %s3082_s15 = scalar_lea.hbm %s3729_s5, 4096 }
  0x29   :  { %p3083_p2 = scmp.ne.s32.totalorder %s3729_s5, %s3082_s15  ;;  %p3086_p3 = scmp.lt.u32.totalorder %s3082_s15, %s3729_s5 }
  0x2b   :  { %p3088_p4 = pnand %p3086_p3, %p3083_p2 }
  0x2d   :  { %3091 = shalt.err (!%p3088_p4)
}
  0x2e   :  { %s3092_s3 = scalar_lea.vmem %s87_s27, 4096  ;;  %p3097_p6 = scmp.lt.s32.totalorder %s87_s27, %s87_s27 }
  0x2f   :  { %p3093_p5 = scmp.ne.s32.totalorder %s87_s27, %s3092_s3  ;;  %p3098_p7 = scmp.lt.s32.totalorder %s3092_s3, %s3092_s3 }
  0x31   :  { %p3099_p8 = por %p3098_p7, %p3097_p6 }
  0x33   :  { %p3100_p9 = pnand %p3099_p8, %p3093_p5 }
  0x35   :  { %3103 = shalt.err (!%p3100_p9)
}
  0x36   :  { %92 = dma.hbm_to_vmem [thread:$0]  %s3729_s5, 4096, %s87_s27, [#allocation12], %s3228_s1, %s3228_s1, %s3229_s18  }
  0x37   :  { %s3104_s25 = scalar_lea.hbm %s3724_s0, 128 }
  0x38   :  { %p3105_p10 = scmp.ne.s32.totalorder %s3724_s0, %s3104_s25  ;;  %p3108_p11 = scmp.lt.u32.totalorder %s3104_s25, %s3724_s0 }
  0x3a   :  { %p3110_p12 = pnand %p3108_p11, %p3105_p10 }
  0x3c   :  { %3113 = shalt.err (!%p3110_p12)
}
  0x3d   :  { %s3114_s15 = scalar_lea.vmem %s3336_s12, 128  ;;  %p3119_p0 = scmp.lt.s32.totalorder %s3336_s12, %s3336_s12 }
  0x3e   :  { %p3115_p13 = scmp.ne.s32.totalorder %s3336_s12, %s3114_s15  ;;  %p3120_p1 = scmp.lt.s32.totalorder %s3114_s15, %s3114_s15 }
  0x40   :  { %p3121_p2 = por %p3120_p1, %p3119_p0 }
  0x42   :  { %p3122_p3 = pnand %p3121_p2, %p3115_p13 }
  0x44   :  { %3125 = shalt.err (!%p3122_p3)
}
  0x45   :  { %32 = dma.hbm_to_vmem [thread:$0]  %s3724_s0, 128, %s3336_s12, [#allocation3], %s3226_s29, %s3226_s29, %s3227_s30  }
  0x46   :  { %s3232_s16 = smov [#allocation7]   ;;  %s3233_s19 = smov [#allocation10]  }
  0x47   :  { %s50_s17 = sshll.u32 %s3232_s16, 4  ;;  %s74_s21 = sshll.u32 %s3233_s19, 4  ;;  %s51_s17 = int_to_ptr.vmem [resolvable:$true] %s50_s17  ;;  %s3373_s21 = int_to_ptr.vmem [resolvable:$true] %s74_s21 }
  0x48   :  { %s3126_s22 = scalar_lea.hbm %s3726_s2, 128 }
  0x49   :  { %p3127_p4 = scmp.ne.s32.totalorder %s3726_s2, %s3126_s22  ;;  %p3130_p5 = scmp.lt.u32.totalorder %s3126_s22, %s3726_s2 }
  0x4b   :  { %p3132_p6 = pnand %p3130_p5, %p3127_p4 }
  0x4d   :  { %3135 = shalt.err (!%p3132_p6)
}
  0x4e   :  { %s3136_s0 = scalar_lea.vmem %s51_s17, 128  ;;  %p3141_p8 = scmp.lt.s32.totalorder %s51_s17, %s51_s17 }
  0x4f   :  { %p3137_p7 = scmp.ne.s32.totalorder %s51_s17, %s3136_s0  ;;  %p3142_p9 = scmp.lt.s32.totalorder %s3136_s0, %s3136_s0 }
  0x51   :  { %p3143_p10 = por %p3142_p9, %p3141_p8 }
  0x53   :  { %p3144_p11 = pnand %p3143_p10, %p3137_p7 }
  0x55   :  { %3147 = shalt.err (!%p3144_p11)
}
  0x56   :  { %56 = dma.hbm_to_vmem [thread:$0]  %s3726_s2, 128, %s51_s17, [#allocation6], %s3226_s29, %s3226_s29, %s3227_s30  }
  0x57   :  { %s3148_s15 = scalar_lea.hbm %s3728_s4, 4096 }
  0x58   :  { %p3149_p12 = scmp.ne.s32.totalorder %s3728_s4, %s3148_s15  ;;  %p3152_p13 = scmp.lt.u32.totalorder %s3148_s15, %s3728_s4 }
  0x5a   :  { %p3154_p0 = pnand %p3152_p13, %p3149_p12 }
  0x5c   :  { %3157 = shalt.err (!%p3154_p0)
}
  0x5d   :  { %s3158_s3 = scalar_lea.vmem %s3373_s21, 4096  ;;  %p3163_p2 = scmp.lt.s32.totalorder %s3373_s21, %s3373_s21 }
  0x5e   :  { %p3159_p1 = scmp.ne.s32.totalorder %s3373_s21, %s3158_s3  ;;  %p3164_p3 = scmp.lt.s32.totalorder %s3158_s3, %s3158_s3 }
  0x60   :  { %p3165_p4 = por %p3164_p3, %p3163_p2 }
  0x62   :  { %p3166_p5 = pnand %p3165_p4, %p3159_p1 }
  0x64   :  { %3169 = shalt.err (!%p3166_p5)
}
  0x65   :  { %80 = dma.hbm_to_vmem [thread:$0]  %s3728_s4, 4096, %s3373_s21, [#allocation9], %s3228_s1, %s3228_s1, %s3229_s18  }
  0x66   :  { %s3234_s20 = smov [#allocation13]   ;;  %s3170_s25 = scalar_lea.hbm %s3730_s6, 4096 }
  0x67   :  { %s98_s22 = sshll.u32 %s3234_s20, 4  ;;  %p3171_p6 = scmp.ne.s32.totalorder %s3730_s6, %s3170_s25  ;;  %s99_s22 = int_to_ptr.vmem [resolvable:$true] %s98_s22 }
  0x68   :  { %p3174_p7 = scmp.lt.u32.totalorder %s3170_s25, %s3730_s6 }
  0x6a   :  { %p3176_p8 = pnand %p3174_p7, %p3171_p6 }
  0x6c   :  { %3179 = shalt.err (!%p3176_p8)
}
  0x6d   :  { %s3180_s13 = scalar_lea.vmem %s99_s22, 4096  ;;  %p3185_p10 = scmp.lt.s32.totalorder %s99_s22, %s99_s22 }
  0x6e   :  { %p3181_p9 = scmp.ne.s32.totalorder %s99_s22, %s3180_s13  ;;  %p3186_p11 = scmp.lt.s32.totalorder %s3180_s13, %s3180_s13 }
  0x70   :  { %p3187_p12 = por %p3186_p11, %p3185_p10 }
  0x72   :  { %p3188_p13 = pnand %p3187_p12, %p3181_p9 }
  0x74   :  { %3191 = shalt.err (!%p3188_p13)
}
  0x75   :  { %104 = dma.hbm_to_vmem [thread:$0]  %s3730_s6, 4096, %s99_s22, [#allocation12], %s3226_s29, %s3226_s29, %s3227_s30  }
  0x76   :  { %3214 = dma.done.wait [#allocation3], 128  }
  0x77   :  { %3215 = vsyncadd [#allocation3], 4294967168 }
  0x78   :  { %3216 = dma.done.wait [#allocation6], 256  }
  0x79   :  { %3217 = vsyncadd [#allocation6], 4294967040 }
  0x7a   :  { %3218 = dma.done.wait [#allocation9], 8192  }
  0x7b   :  { %3219 = vsyncadd [#allocation9], 4294959104 }
  0x7c   :  { %3220 = dma.done.wait [#allocation12], 8192  }
  0x7d   :  { %3221 = vsyncadd [#allocation12], 4294959104  ;;  %v3235_v0 = vmov 0   ;;  %v2827_v1 = vld [vmem:[#allocation8 + $0x4] ss:$16 sps:$4 sm:$0xff]   ;;  %v2851_v23 = vld [vmem:[#allocation2] sm:$0xff]  }
  0x7e   :  { %389 = vmatprep.mubr.bf16.mxu0 %v3235_v0  ;;  %432 = vmatprep.mubr.bf16.mxu1 %v3235_v0  ;;  %v2829_v2 = vld [vmem:[#allocation8] ss:$16 sps:$4 sm:$0xff]   ;;  %v2830_v3 = vld [vmem:[#allocation8 + $0x24] ss:$16 sps:$4 sm:$0xff]   ;;  %v2877_v16 = vld [vmem:[#allocation8 + $0xc] ss:$16 sps:$4 sm:$0xff]  }
  0x7f   :  { %357 = vmatprep.subr.bf16.mxu0 %v2827_v1  ;;  %v2832_v4 = vld [vmem:[#allocation8 + $0x20] ss:$16 sps:$4 sm:$0xff]   ;;  %v2833_v5 = vld [vmem:[#allocation8 + $0x44] ss:$16 sps:$4 sm:$0xff]   ;;  %v2879_v17 = vld [vmem:[#allocation8 + $0x8] ss:$16 sps:$4 sm:$0xff]   ;;  %400 = vmatprep.subr.bf16.mxu1 %v2877_v16 }
  0x80   :  { %358 = vmatpush1.bf16.msra.mxu0 %v2829_v2  ;;  %v2835_v6 = vld [vmem:[#allocation8 + $0x40] ss:$16 sps:$4 sm:$0xff]   ;;  %v2836_v7 = vld [vmem:[#allocation8 + $0x64] ss:$16 sps:$4 sm:$0xff]   ;;  %v2880_v18 = vld [vmem:[#allocation8 + $0x2c] ss:$16 sps:$4 sm:$0xff]   ;;  %401 = vmatpush1.bf16.msra.mxu1 %v2879_v17 }
  0x81   :  { %359 = vmatprep.subr.bf16.mxu0 %v2830_v3  ;;  %v2838_v8 = vld [vmem:[#allocation8 + $0x60] ss:$16 sps:$4 sm:$0xff]   ;;  %v2839_v9 = vld [vmem:[#allocation8 + $0x84] ss:$16 sps:$4 sm:$0xff]   ;;  %v2882_v20 = vld [vmem:[#allocation8 + $0x28] ss:$16 sps:$4 sm:$0xff]   ;;  %402 = vmatprep.subr.bf16.mxu1 %v2880_v18 }
  0x82   :  { %v2841_v10 = vld [vmem:[#allocation8 + $0x80] ss:$16 sps:$4 sm:$0xff]   ;;  %v2842_v11 = vld [vmem:[#allocation8 + $0xa4] ss:$16 sps:$4 sm:$0xff]   ;;  %v2883_v22 = vld [vmem:[#allocation8 + $0x4c] ss:$16 sps:$4 sm:$0xff]  }
  0x83   :  { %v2844_v12 = vld [vmem:[#allocation8 + $0xa0] ss:$16 sps:$4 sm:$0xff]   ;;  %v2845_v13 = vld [vmem:[#allocation8 + $0xc4] ss:$16 sps:$4 sm:$0xff]   ;;  %v2885_v26 = vld [vmem:[#allocation8 + $0x48] ss:$16 sps:$4 sm:$0xff]  }
  0x84   :  { %360 = vmatpush1.bf16.msra.mxu0 %v2832_v4  ;;  %v2847_v14 = vld [vmem:[#allocation8 + $0xc0] ss:$16 sps:$4 sm:$0xff]   ;;  %v2848_v15 = vld [vmem:[#allocation8 + $0xe4] ss:$16 sps:$4 sm:$0xff]   ;;  %403 = vmatpush1.bf16.msra.mxu1 %v2882_v20  ;;  %v2886_v27 = vld [vmem:[#allocation8 + $0x6c] ss:$16 sps:$4 sm:$0xff]  }
  0x85   :  { %361 = vmatprep.subr.bf16.mxu0 %v2833_v5  ;;  %v2850_v19 = vld [vmem:[#allocation8 + $0xe0] ss:$16 sps:$4 sm:$0xff]   ;;  %v2854_v21 = vld [vmem:[#allocation10 + $0x4] ss:$16 sps:$4 sm:$0xff]   ;;  %404 = vmatprep.subr.bf16.mxu1 %v2883_v22  ;;  %v2888_v30 = vld [vmem:[#allocation8 + $0x68] ss:$16 sps:$4 sm:$0xff]  }
  0x86   :  { %v2852_v24 = vld [vmem:[#allocation10] ss:$16 sps:$4 sm:$0xff]   ;;  %v2857_v25 = vld [vmem:[#allocation10 + $0x24] ss:$16 sps:$4 sm:$0xff]   ;;  %v2889_v31 = vld [vmem:[#allocation8 + $0x8c] ss:$16 sps:$4 sm:$0xff]  }
  0x87   :  { %v2855_v28 = vld [vmem:[#allocation10 + $0x20] ss:$16 sps:$4 sm:$0xff]   ;;  %v2860_v29 = vld [vmem:[#allocation10 + $0x44] ss:$16 sps:$4 sm:$0xff]   ;;  %v2891_v34 = vld [vmem:[#allocation8 + $0x88] ss:$16 sps:$4 sm:$0xff]  }
  0x88   :  { %362 = vmatpush1.bf16.msra.mxu0 %v2835_v6  ;;  %405 = vmatpush1.bf16.msra.mxu1 %v2885_v26  ;;  %v2858_v32 = vld [vmem:[#allocation10 + $0x40] ss:$16 sps:$4 sm:$0xff]   ;;  %v2863_v33 = vld [vmem:[#allocation10 + $0x64] ss:$16 sps:$4 sm:$0xff]   ;;  %v2892_v35 = vld [vmem:[#allocation8 + $0xac] ss:$16 sps:$4 sm:$0xff]  }
  0x89   :  { %363 = vmatprep.subr.bf16.mxu0 %v2836_v7  ;;  %406 = vmatprep.subr.bf16.mxu1 %v2886_v27  ;;  %v2861_v36 = vld [vmem:[#allocation10 + $0x60] ss:$16 sps:$4 sm:$0xff]   ;;  %v2866_v37 = vld [vmem:[#allocation10 + $0x84] ss:$16 sps:$4 sm:$0xff]   ;;  %v2894_v38 = vld [vmem:[#allocation8 + $0xa8] ss:$16 sps:$4 sm:$0xff]  }
  0x8a   :  { %v2864_v39 = vld [vmem:[#allocation10 + $0x80] ss:$16 sps:$4 sm:$0xff]   ;;  %v2895_v40 = vld [vmem:[#allocation8 + $0xcc] ss:$16 sps:$4 sm:$0xff]   ;;  %v2869_v41 = vld [vmem:[#allocation10 + $0xa4] ss:$16 sps:$4 sm:$0xff]  }
  0x8b   :  { %v2897_v42 = vld [vmem:[#allocation8 + $0xc8] ss:$16 sps:$4 sm:$0xff]   ;;  %v2898_v43 = vld [vmem:[#allocation8 + $0xec] ss:$16 sps:$4 sm:$0xff]   ;;  %v2867_v44 = vld [vmem:[#allocation10 + $0xa0] ss:$16 sps:$4 sm:$0xff]  }
  0x8c   :  { %364 = vmatpush1.bf16.msra.mxu0 %v2838_v8  ;;  %407 = vmatpush1.bf16.msra.mxu1 %v2888_v30  ;;  %v2872_v45 = vld [vmem:[#allocation10 + $0xc4] ss:$16 sps:$4 sm:$0xff]   ;;  %v2900_v46 = vld [vmem:[#allocation8 + $0xe8] ss:$16 sps:$4 sm:$0xff]   ;;  %v2903_v47 = vld [vmem:[#allocation10 + $0xc] ss:$16 sps:$4 sm:$0xff]  }
  0x8d   :  { %365 = vmatprep.subr.bf16.mxu0 %v2839_v9  ;;  %408 = vmatprep.subr.bf16.mxu1 %v2889_v31  ;;  %v2870_v48 = vld [vmem:[#allocation10 + $0xc0] ss:$16 sps:$4 sm:$0xff]   ;;  %v2875_v49 = vld [vmem:[#allocation10 + $0xe4] ss:$16 sps:$4 sm:$0xff]   ;;  %v2901_v50 = vld [vmem:[#allocation10 + $0x8] ss:$16 sps:$4 sm:$0xff]  }
  0x8e   :  { %v2906_v51 = vld [vmem:[#allocation10 + $0x2c] ss:$16 sps:$4 sm:$0xff]   ;;  %v2873_v52 = vld [vmem:[#allocation10 + $0xe0] ss:$16 sps:$4 sm:$0xff]   ;;  %v2904_v53 = vld [vmem:[#allocation10 + $0x28] ss:$16 sps:$4 sm:$0xff]  }
  0x8f   :  { %v2909_v54 = vld [vmem:[#allocation10 + $0x4c] ss:$16 sps:$4 sm:$0xff]   ;;  %v2876_v55 = vld [vmem:[#allocation5] sm:$0xff]   ;;  %v2907_v56 = vld [vmem:[#allocation10 + $0x48] ss:$16 sps:$4 sm:$0xff]   ;;  %v3236_v20 = vmov 0.0  }
  0x90   :  { %366 = vmatpush1.bf16.msra.mxu0 %v2841_v10  ;;  %409 = vmatpush1.bf16.msra.mxu1 %v2891_v34  ;;  %v2912_v57 = vld [vmem:[#allocation10 + $0x6c] ss:$16 sps:$4 sm:$0xff]   ;;  %v2910_v58 = vld [vmem:[#allocation10 + $0x68] ss:$16 sps:$4 sm:$0xff]   ;;  %vm3237_vm0 = vmmov 0   ;;  %vm1145_vm1 = vcmask 64512  }
  0x91   :  { %367 = vmatprep.subr.bf16.mxu0 %v2842_v11  ;;  %410 = vmatprep.subr.bf16.mxu1 %v2892_v35  ;;  %v2915_v59 = vld [vmem:[#allocation10 + $0x8c] ss:$16 sps:$4 sm:$0xff]   ;;  %v2913_v60 = vld [vmem:[#allocation10 + $0x88] ss:$16 sps:$4 sm:$0xff]   ;;  %v2952_v22 = vld [vmem:[#allocation11 + $0x4] ss:$16 sps:$4 sm:$0xff]  }
  0x92   :  { %v2918_v61 = vld [vmem:[#allocation10 + $0xac] ss:$16 sps:$4 sm:$0xff]   ;;  %v2916_v62 = vld [vmem:[#allocation10 + $0xa8] ss:$16 sps:$4 sm:$0xff]   ;;  %v2956_v26 = vld [vmem:[#allocation11 + $0x40] ss:$16 sps:$4 sm:$0xff]  }
  0x93   :  { %v2921_v63 = vld [vmem:[#allocation10 + $0xcc] ss:$16 sps:$4 sm:$0xff]   ;;  %v2919_v1 = vld [vmem:[#allocation10 + $0xc8] ss:$16 sps:$4 sm:$0xff]   ;;  %v2961_v27 = vld [vmem:[#allocation11 + $0x64] ss:$16 sps:$4 sm:$0xff]  }
  0x94   :  { %368 = vmatpush1.bf16.msra.mxu0 %v2844_v12  ;;  %411 = vmatpush1.bf16.msra.mxu1 %v2894_v38  ;;  %v2924_v2 = vld [vmem:[#allocation10 + $0xec] ss:$16 sps:$4 sm:$0xff]   ;;  %v2922_v3 = vld [vmem:[#allocation10 + $0xe8] ss:$16 sps:$4 sm:$0xff]   ;;  %v2962_v30 = vld [vmem:[#allocation11 + $0x80] ss:$16 sps:$4 sm:$0xff]  }
  0x95   :  { %369 = vmatprep.subr.bf16.mxu0 %v2845_v13  ;;  %412 = vmatprep.subr.bf16.mxu1 %v2895_v40  ;;  %v2927_v4 = vld [vmem:[#allocation11 + $0xc] ss:$16 sps:$4 sm:$0xff]   ;;  %v2925_v5 = vld [vmem:[#allocation11 + $0x8] ss:$16 sps:$4 sm:$0xff]   ;;  %v2967_v31 = vld [vmem:[#allocation11 + $0xa4] ss:$16 sps:$4 sm:$0xff]  }
  0x96   :  { %v2930_v6 = vld [vmem:[#allocation11 + $0x2c] ss:$16 sps:$4 sm:$0xff]   ;;  %v2928_v7 = vld [vmem:[#allocation11 + $0x28] ss:$16 sps:$4 sm:$0xff]   ;;  %v2968_v34 = vld [vmem:[#allocation11 + $0xc0] ss:$16 sps:$4 sm:$0xff]  }
  0x97   :  { %v2933_v8 = vld [vmem:[#allocation11 + $0x4c] ss:$16 sps:$4 sm:$0xff]   ;;  %v2931_v9 = vld [vmem:[#allocation11 + $0x48] ss:$16 sps:$4 sm:$0xff]   ;;  %v2973_v35 = vld [vmem:[#allocation11 + $0xe4] ss:$16 sps:$4 sm:$0xff]  }
  0x98   :  { %370 = vmatpush1.bf16.msra.mxu0 %v2847_v14  ;;  %413 = vmatpush1.bf16.msra.mxu1 %v2897_v42  ;;  %v2936_v10 = vld [vmem:[#allocation11 + $0x6c] ss:$16 sps:$4 sm:$0xff]   ;;  %v2934_v11 = vld [vmem:[#allocation11 + $0x68] ss:$16 sps:$4 sm:$0xff]   ;;  %vm1169_vm2 = vcmask 1043456   ;;  %s3238_s17 = smov [#allocation14]  }
  0x99   :  { %371 = vmatprep.subr.bf16.mxu0 %v2848_v15  ;;  %414 = vmatprep.subr.bf16.mxu1 %v2898_v43  ;;  %v2939_v12 = vld [vmem:[#allocation11 + $0x8c] ss:$16 sps:$4 sm:$0xff]   ;;  %v2937_v13 = vld [vmem:[#allocation11 + $0x88] ss:$16 sps:$4 sm:$0xff]   ;;  %s2379_s20 = sshll.u32 %s3238_s17, 4  ;;  %s2380_s20 = int_to_ptr.vmem [resolvable:$true] %s2379_s20 }
  0x9a   :  { %v2942_v14 = vld [vmem:[#allocation11 + $0xac] ss:$16 sps:$4 sm:$0xff]   ;;  %v2940_v15 = vld [vmem:[#allocation11 + $0xa8] ss:$16 sps:$4 sm:$0xff]   ;;  %s3192_s22 = scalar_lea.vmem %s2380_s20, 512  ;;  %p3197_p1 = scmp.lt.s32.totalorder %s2380_s20, %s2380_s20 }
  0x9b   :  { %v2943_v16 = vld [vmem:[#allocation11 + $0xc8] ss:$16 sps:$4 sm:$0xff]   ;;  %v2948_v17 = vld [vmem:[#allocation11 + $0xec] ss:$16 sps:$4 sm:$0xff]   ;;  %p3193_p0 = scmp.ne.s32.totalorder %s2380_s20, %s3192_s22  ;;  %p3198_p2 = scmp.lt.s32.totalorder %s3192_s22, %s3192_s22 }
  0x9c   :  { %372 = vmatpush1.bf16.msra.mxu0 %v2850_v19  ;;  %415 = vmatpush1.bf16.msra.mxu1 %v2900_v46  ;;  %v2946_v18 = vld [vmem:[#allocation11 + $0xe8] ss:$16 sps:$4 sm:$0xff]  }
  0x9d   :  { %665 = vmatprep.subr.bf16.mxu0 %v2854_v21  ;;  %708 = vmatprep.subr.bf16.mxu1 %v2903_v47  ;;  %v2949_v19 = vld [vmem:[#allocation7] sm:$0xff]   ;;  %v2950_v21 = vld [vmem:[#allocation11] ss:$16 sps:$4 sm:$0xff]   ;;  %p3199_p3 = por %p3198_p2, %p3197_p1 }
  0x9f   :  { %390 = vmatmul.mubr.bf16.vlgmr.msra.gmra.mrb[0].mxu0 %v2851_v23  ;;  %433 = vmatmul.mubr.bf16.vlgmr.msra.gmra.mrb[0].mxu1 %v2851_v23  ;;  %v2955_v23 = vld [vmem:[#allocation11 + $0x24] ss:$16 sps:$4 sm:$0xff]   ;;  %p3200_p4 = pnand %p3199_p3, %p3193_p0 }
  0xa0   :  { %666 = vmatpush1.bf16.msra.mxu0 %v2852_v24  ;;  %697 = vmatprep.mubr.bf16.mxu0 %v3235_v0  ;;  %v2953_v24 = vld [vmem:[#allocation11 + $0x20] ss:$16 sps:$4 sm:$0xff]  }
  0xa1   :  { %667 = vmatprep.subr.bf16.mxu0 %v2857_v25  ;;  %709 = vmatpush1.bf16.msra.mxu1 %v2901_v50  ;;  %v2958_v25 = vld [vmem:[#allocation11 + $0x44] ss:$16 sps:$4 sm:$0xff]  }
  0xa2   :  { %710 = vmatprep.subr.bf16.mxu1 %v2906_v51  ;;  %740 = vmatprep.mubr.bf16.mxu1 %v3235_v0 }
  0xa4   :  { %668 = vmatpush1.bf16.msra.mxu0 %v2855_v28  ;;  %v2959_v28 = vld [vmem:[#allocation11 + $0x60] ss:$16 sps:$4 sm:$0xff]  }
  0xa5   :  { %669 = vmatprep.subr.bf16.mxu0 %v2860_v29  ;;  %711 = vmatpush1.bf16.msra.mxu1 %v2904_v53  ;;  %v2964_v29 = vld [vmem:[#allocation11 + $0x84] ss:$16 sps:$4 sm:$0xff]  }
  0xa6   :  { %712 = vmatprep.subr.bf16.mxu1 %v2909_v54 }
  0xa8   :  { %670 = vmatpush1.bf16.msra.mxu0 %v2858_v32  ;;  %v2965_v32 = vld [vmem:[#allocation11 + $0xa0] ss:$16 sps:$4 sm:$0xff]  }
  0xa9   :  { %671 = vmatprep.subr.bf16.mxu0 %v2863_v33  ;;  %713 = vmatpush1.bf16.msra.mxu1 %v2907_v56  ;;  %v2970_v33 = vld [vmem:[#allocation11 + $0xc4] ss:$16 sps:$4 sm:$0xff]  }
  0xaa   :  { %714 = vmatprep.subr.bf16.mxu1 %v2912_v57 }
  0xac   :  { %672 = vmatpush1.bf16.msra.mxu0 %v2861_v36  ;;  %v2971_v36 = vld [vmem:[#allocation11 + $0xe0] ss:$16 sps:$4 sm:$0xff]  }
  0xad   :  { %673 = vmatprep.subr.bf16.mxu0 %v2866_v37  ;;  %715 = vmatpush1.bf16.msra.mxu1 %v2910_v58 }
  0xae   :  { %716 = vmatprep.subr.bf16.mxu1 %v2915_v59 }
  0xb0   :  { %674 = vmatpush1.bf16.msra.mxu0 %v2864_v39 }
  0xb1   :  { %675 = vmatprep.subr.bf16.mxu0 %v2869_v41  ;;  %717 = vmatpush1.bf16.msra.mxu1 %v2913_v60  ;;  %v171_v41 = vlaneseq }
  0xb2   :  { %718 = vmatprep.subr.bf16.mxu1 %v2918_v61 }
  0xb3   :  { %v172_v42 = vshrl.u32 %v171_v41, 7 }
  0xb4   :  { %676 = vmatpush1.bf16.msra.mxu0 %v2867_v44  ;;  %v477_v44 = vld [vmem:[%s3732_s8] sm:$0xf] }
  0xb5   :  { %677 = vmatprep.subr.bf16.mxu0 %v2872_v45  ;;  %719 = vmatpush1.bf16.msra.mxu1 %v2916_v62  ;;  %v3448_v46 = vsub.s32 0, %v172_v42 }
  0xb6   :  { %720 = vmatprep.subr.bf16.mxu1 %v2921_v63 }
  0xb7   :  { %v482_v50 = vrot.slane %v477_v44, %v3448_v46 }
  0xb8   :  { %678 = vmatpush1.bf16.msra.mxu0 %v2870_v48  ;;  %v3452_v48 = vsub.s32 1, %v172_v42 }
  0xb9   :  { %679 = vmatprep.subr.bf16.mxu0 %v2875_v49  ;;  %721 = vmatpush1.bf16.msra.mxu1 %v2919_v1 }
  0xba   :  { %722 = vmatprep.subr.bf16.mxu1 %v2924_v2  ;;  %v486_v51 = vrot.slane %v477_v44, %v3452_v48 }
  0xbc   :  { %680 = vmatpush1.bf16.msra.mxu0 %v2873_v52  ;;  %v3461_v52 = vld [vmem:[%s3731_s7] sm:$0xf] }
  0xbd   :  { %723 = vmatpush1.bf16.msra.mxu1 %v2922_v3  ;;  %973 = vmatprep.subr.bf16.mxu0 %v2952_v22  ;;  %v174_v56 = vrot.slane %v3461_v52, %v3448_v46 }
  0xbe   :  { %1016 = vmatprep.subr.bf16.mxu1 %v2927_v4 }
  0xbf   :  { %698 = vmatmul.mubr.bf16.vlgmr.msra.gmra.mrb[4].mxu0 %v2876_v55 }
  0xc0   :  { %1005 = vmatprep.mubr.bf16.mxu0 %v3235_v0  ;;  %741 = vmatmul.mubr.bf16.vlgmr.msra.gmra.mrb[4].mxu1 %v2876_v55 }
  0xc1   :  { %1017 = vmatpush1.bf16.msra.mxu1 %v2925_v5  ;;  %1048 = vmatprep.mubr.bf16.mxu1 %v3235_v0  ;;  %v2945_v0 = vld [vmem:[#allocation11 + $0xcc] ss:$16 sps:$4 sm:$0xff]   ;;  %v3473_v5 = vsub.s32 2, %v172_v42 }
  0xc2   :  { %1018 = vmatprep.subr.bf16.mxu1 %v2930_v6  ;;  %974 = vmatpush1.bf16.msra.mxu0 %v2950_v21  ;;  %v3475_v6 = vsub.s32 3, %v172_v42 }
  0xc3   :  { %975 = vmatprep.subr.bf16.mxu0 %v2955_v23 }
  0xc5   :  { %1019 = vmatpush1.bf16.msra.mxu1 %v2928_v7  ;;  %v490_v7 = vrot.slane %v477_v44, %v3473_v5 }
  0xc6   :  { %1020 = vmatprep.subr.bf16.mxu1 %v2933_v8  ;;  %976 = vmatpush1.bf16.msra.mxu0 %v2953_v24  ;;  %v494_v8 = vrot.slane %v477_v44, %v3475_v6 }
  0xc7   :  { %977 = vmatprep.subr.bf16.mxu0 %v2958_v25 }
  0xc9   :  { %1021 = vmatpush1.bf16.msra.mxu1 %v2931_v9 }
  0xca   :  { %1022 = vmatprep.subr.bf16.mxu1 %v2936_v10  ;;  %978 = vmatpush1.bf16.msra.mxu0 %v2956_v26 }
  0xcb   :  { %979 = vmatprep.subr.bf16.mxu0 %v2961_v27 }
  0xcd   :  { %1023 = vmatpush1.bf16.msra.mxu1 %v2934_v11 }
  0xce   :  { %1024 = vmatprep.subr.bf16.mxu1 %v2939_v12  ;;  %980 = vmatpush1.bf16.msra.mxu0 %v2959_v28 }
  0xcf   :  { %981 = vmatprep.subr.bf16.mxu0 %v2964_v29 }
  0xd1   :  { %1025 = vmatpush1.bf16.msra.mxu1 %v2937_v13 }
  0xd2   :  { %1026 = vmatprep.subr.bf16.mxu1 %v2942_v14  ;;  %982 = vmatpush1.bf16.msra.mxu0 %v2962_v30 }
  0xd3   :  { %983 = vmatprep.subr.bf16.mxu0 %v2967_v31 }
  0xd5   :  { %1027 = vmatpush1.bf16.msra.mxu1 %v2940_v15 }
  0xd6   :  { %1028 = vmatprep.subr.bf16.mxu1 %v2945_v0  ;;  %984 = vmatpush1.bf16.msra.mxu0 %v2965_v32 }
  0xd7   :  { %985 = vmatprep.subr.bf16.mxu0 %v2970_v33 }
  0xd9   :  { %1029 = vmatpush1.bf16.msra.mxu1 %v2943_v16  ;;  %v785_v16 = vld [vmem:[%s3733_s9] sm:$0xf] }
  0xda   :  { %1030 = vmatprep.subr.bf16.mxu1 %v2948_v17  ;;  %986 = vmatpush1.bf16.msra.mxu0 %v2968_v34  ;;  %v3493_v17 = vrot.slane %v785_v16, %v3473_v5 }
  0xdb   :  { %987 = vmatprep.subr.bf16.mxu0 %v2973_v35 }
  0xdd   :  { %1031 = vmatpush1.bf16.msra.mxu1 %v2946_v18 }
  0xde   :  { %2636 = vmatprep.subr.bf16.mxu1 %v3236_v20  ;;  %988 = vmatpush1.bf16.msra.mxu0 %v2971_v36  ;;  %v790_v36 = vrot.slane %v785_v16, %v3448_v46 }
  0xdf   :  { %2660 = vmatprep.subr.bf16.mxu0 %v3236_v20 }
  0xe0   :  { %1049 = vmatmul.mubr.bf16.vlgmr.msra.gmra.mrb[8].mxu1 %v2949_v19 }
  0xe1   :  { %2638 = vmatprep.mubr.msk.bf16.mxu1 %vm3237_vm0, %v3236_v20  ;;  %1006 = vmatmul.mubr.bf16.vlgmr.msra.gmra.mrb[8].mxu0 %v2949_v19  ;;  %v3498_v19 = vrot.slane %v785_v16, %v3475_v6 }
  0xe2   :  { %2676 = vmatprep.mubr.msk.bf16.mxu0 %vm3237_vm0, %v3236_v20 }
 0x172   :  { %v391_v37 = vpop.f32.mrb[0].mxu0  ;;  %v3441_v43 = vpop.f32.mrb[0].mxu1 }
 0x173   :  { %v3437_v38 = vpop.f32.mrb[1].mxu0  ;;  %v3446_v45 = vpop.f32.mrb[1].mxu1  ;;  %v392_v62 = vadd.f32 %v391_v37, %v174_v56 }
 0x174   :  { %v395_v39 = vpop.f32.mrb[2].mxu0  ;;  %v3450_v47 = vpop.f32.mrb[2].mxu1 }
 0x175   :  { %v3439_v40 = vpop.f32.mrb[3].mxu0  ;;  %v3454_v49 = vpop.f32.mrb[3].mxu1  ;;  %v1059_v1 = vpack.c.bf16 %v392_v62, %v392_v62  ;;  %v396_v3 = vadd.f32 %v395_v39, %v174_v56  ;;  %v794_v39 = vrot.slane %v785_v16, %v3452_v48 }
 0x177   :  { %v1060_v4 = vpack.c.bf16 %v396_v3, %v396_v3 }
 0x192   :  { %v699_v53 = vpop.f32.mrb[4].mxu0 }
 0x193   :  { %v700_v54 = vadd.f32 %v699_v53, %v482_v50  ;;  %v701_v55 = vpop.f32.mrb[5].mxu0  ;;  %v742_v9 = vpop.f32.mrb[4].mxu1 }
 0x194   :  { %v3465_v57 = vadd.f32 %v701_v55, %v486_v51  ;;  %v703_v58 = vpop.f32.mrb[6].mxu0  ;;  %v3481_v10 = vadd.f32 %v742_v9, %v490_v7  ;;  %v744_v11 = vpop.f32.mrb[5].mxu1 }
 0x195   :  { %v1061_v59 = vpack.c.bf16 %v700_v54, %v700_v54  ;;  %v705_v60 = vpop.f32.mrb[7].mxu0  ;;  %v704_v63 = vadd.f32 %v703_v58, %v482_v50  ;;  %v3483_v12 = vadd.f32 %v744_v11, %v494_v8  ;;  %v746_v13 = vpop.f32.mrb[6].mxu1 }
 0x196   :  { %v3467_v61 = vadd.f32 %v705_v60, %v486_v51  ;;  %v3485_v14 = vadd.f32 %v746_v13, %v490_v7  ;;  %v748_v15 = vpop.f32.mrb[7].mxu1  ;;  %v1389_v9 = vpack.c.bf16 %v3465_v57, %v3465_v57 }
 0x197   :  { %2637 = vmatpush3.bf16.xpose.msra.mxu1 %v1061_v59  ;;  %v1062_v2 = vpack.c.bf16 %v704_v63, %v704_v63  ;;  %v3487_v0 = vadd.f32 %v748_v15, %v494_v8  ;;  %v178_v8 = vrot.slane %v3461_v52, %v3452_v48 }
 0x198   :  { %2642 = vmatprep.subr.bf16.mxu1 %v3236_v20  ;;  %v1390_v15 = vpack.c.bf16 %v3467_v61, %v3467_v61 }
 0x199   :  { %v394_v11 = vadd.f32 %v3437_v38, %v178_v8  ;;  %v398_v48 = vadd.f32 %v3439_v40, %v178_v8  ;;  %v1719_v8 = vpack.c.bf16 %v3485_v14, %v3485_v14 }
 0x19b   :  { %v1387_v13 = vpack.c.bf16 %v394_v11, %v394_v11 }
 0x19e   :  { %2639 = vmatmul.mubr.bf16.vlgmr.msra.gmra.mrb[12].mxu1 %v1059_v1 }
 0x19f   :  { %2643 = vmatpush3.bf16.xpose.msra.mxu1 %v1062_v2  ;;  %2644 = vmatprep.mubr.msk.bf16.mxu1 %vm3237_vm0, %v3236_v20 }
 0x1a0   :  { %2648 = vmatprep.subr.bf16.mxu1 %v3236_v20 }
 0x1a6   :  { %2645 = vmatmul.mubr.bf16.vlgmr.msra.gmra.mrb[16].mxu1 %v1060_v4 }
 0x1a7   :  { %2650 = vmatprep.mubr.msk.bf16.mxu1 %vm3237_vm0, %v3236_v20 }
 0x1b3   :  { %v3495_v18 = vpop.f32.mrb[8].mxu1 }
 0x1b4   :  { %v3500_v21 = vpop.f32.mrb[9].mxu1  ;;  %v1007_v37 = vpop.f32.mrb[8].mxu0 }
 0x1b5   :  { %v1054_v22 = vpop.f32.mrb[10].mxu1  ;;  %v1009_v41 = vpop.f32.mrb[9].mxu0  ;;  %v1008_v42 = vadd.f32 %v1007_v37, %v790_v36 }
 0x1b6   :  { %v3503_v23 = vadd.f32 %v1054_v22, %v3493_v17  ;;  %v1056_v24 = vpop.f32.mrb[11].mxu1  ;;  %v1011_v44 = vpop.f32.mrb[10].mxu0  ;;  %v1010_v16 = vadd.f32 %v1009_v41, %v794_v39  ;;  %v1388_v22 = vpack.c.bf16 %v398_v48, %v398_v48 }
 0x1b7   :  { %v3506_v25 = vadd.f32 %v1056_v24, %v3498_v19  ;;  %v1012_v50 = vadd.f32 %v1011_v44, %v790_v36  ;;  %v1013_v51 = vpop.f32.mrb[11].mxu0  ;;  %v1063_v53 = vpack.c.bf16 %v1008_v42, %v1008_v42 }
 0x1b8   :  { %v3512_v54 = vadd.f32 %v1013_v51, %v794_v39  ;;  %v1391_v57 = vpack.c.bf16 %v1010_v16, %v1010_v16 }
 0x1b9   :  { %v1171_v55 = vsel %vm1169_vm2, %v1063_v53, 0  ;;  %v1064_v63 = vpack.c.bf16 %v1012_v50, %v1012_v50 }
 0x1ba   :  { %2649 = vmatpush3.bf16.msra.mxu1 %v1171_v55  ;;  %v1497_v38 = vsel %vm1169_vm2, %v1391_v57, 0 }
 0x1bb   :  { %2654 = vmatprep.subr.bf16.mxu1 %v3236_v20  ;;  %v1217_v3 = vsel %vm1169_vm2, %v1064_v63, 0  ;;  %v182_v63 = vrot.slane %v3461_v52, %v3473_v5  ;;  %v1051_v5 = vadd.f32 %v3495_v18, %v3493_v17 }
 0x271   :  { %v1099_v26 = vpop.f32.mrb[12].mxu1 }
 0x272   :  { %v2640_v27 = vpop.f32.mrb[13].mxu1  ;;  %v1146_v28 = vsel %vm1145_vm1, %v1099_v26, -inf }
 0x273   :  { %1147 = vmax.xlane.f32.xlu0 %v1146_v28  ;;  %v1102_v29 = vpop.f32.mrb[14].mxu1 }
 0x274   :  { %v2641_v30 = vpop.f32.mrb[15].mxu1 }
 0x279   :  { %v1139_v31 = vpop.f32.mrb[16].mxu1 }
 0x27a   :  { %v2646_v32 = vpop.f32.mrb[17].mxu1  ;;  %v1149_v33 = vsel %vm1145_vm1, %v1139_v31, -inf }
 0x27b   :  { %1150 = vmax.xlane.f32.xlu0 %v1149_v33  ;;  %v1142_v34 = vpop.f32.mrb[18].mxu1 }
 0x27c   :  { %v2647_v35 = vpop.f32.mrb[19].mxu1 }
 0x300   :  { %v1148_v56 = vpop.xlane.xlu0 %1147 }
 0x301   :  { %v1152_v58 = vsub.f32 %v1099_v26, %v1148_v56 }
 0x303   :  { %v1154_v46 = vmul.f32 1.442695, %v1152_v58  ;;  %v1392_v58 = vpack.c.bf16 %v3512_v54, %v3512_v54 }
 0x305   :  { %3006 = vpow2.f32 %v1154_v46 }
 0x308   :  { %v1151_v59 = vpop.xlane.xlu0 %1150 }
 0x309   :  { %v1153_v60 = vsub.f32 %v1139_v31, %v1151_v59 }
 0x30b   :  { %v1156_v62 = vmul.f32 1.442695, %v1153_v60  ;;  %v1543_v60 = vsel %vm1169_vm2, %v1392_v58, 0  ;;  %v2048_v58 = vpack.c.bf16 %v3487_v0, %v3487_v0  ;;  %v2974_v0 = vld [vmem:[#allocation13] sm:$0xff]  }
 0x30c   :  { %2661 = vmatpush3.bf16.msra.mxu0 %v2974_v0 }
 0x30d   :  { %3008 = vpow2.f32 %v1156_v62  ;;  %2662 = vmatprep.subr.bf16.mxu0 %v3236_v20 }
 0x30f   :  { %v3516_v1 = vpop.eup %3006 }
 0x310   :  { %v1164_v2 = vpack.c.bf16 %v3516_v1, %v3516_v1 }
 0x312   :  { %2651 = vmatmul.mubr.msk.bf16.vlgmr.msra.gmra.mrb[20].mxu1 %vm1145_vm1, %v1164_v2  ;;  %v1718_v2 = vpack.c.bf16 %v3481_v10, %v3481_v10  ;;  %v439_v10 = vadd.f32 %v3450_v47, %v182_v63 }
 0x313   :  { %2655 = vmatpush3.bf16.msra.mxu1 %v1217_v3  ;;  %2656 = vmatprep.mubr.msk.bf16.mxu1 %vm3237_vm0, %v3236_v20  ;;  %v435_v3 = vadd.f32 %v3441_v43, %v182_v63 }
 0x314   :  { %2680 = vmatprep.subr.bf16.mxu1 %v3236_v20  ;;  %v1717_v43 = vpack.c.bf16 %v439_v10, %v439_v10 }
 0x317   :  { %v3525_v4 = vpop.eup %3008 }
 0x318   :  { %v1165_v7 = vpack.c.bf16 %v3525_v4, %v3525_v4 }
 0x31a   :  { %2657 = vmatmul.mubr.msk.bf16.vlgmr.msra.gmra.mrb[24].mxu1 %vm1145_vm1, %v1165_v7  ;;  %v1716_v7 = vpack.c.bf16 %v435_v3, %v435_v3 }
 0x31b   :  { %2682 = vmatprep.mubr.msk.bf16.mxu1 %vm3237_vm0, %v3236_v20 }
 0x31c   :  { %2681 = vmatpush3.bf16.xpose.msra.mxu1 %v1389_v9  ;;  %v1720_v9 = vpack.c.bf16 %v1051_v5, %v1051_v5 }
 0x31d   :  { %2686 = vmatprep.subr.bf16.mxu1 %v3236_v20 }
 0x31e   :  { %v1826_v11 = vsel %vm1169_vm2, %v1720_v9, 0 }
 0x323   :  { %2683 = vmatmul.mubr.bf16.vlgmr.msra.gmra.mrb[28].mxu1 %v1387_v13 }
 0x324   :  { %2687 = vmatpush3.bf16.xpose.msra.mxu1 %v1390_v15  ;;  %2688 = vmatprep.mubr.msk.bf16.mxu1 %vm3237_vm0, %v3236_v20 }
 0x325   :  { %2692 = vmatprep.subr.bf16.mxu1 %v3236_v20 }
 0x32b   :  { %2689 = vmatmul.mubr.bf16.vlgmr.msra.gmra.mrb[32].mxu1 %v1388_v22 }
 0x32c   :  { %2693 = vmatpush3.bf16.msra.mxu1 %v1497_v38  ;;  %2694 = vmatprep.mubr.msk.bf16.mxu1 %vm3237_vm0, %v3236_v20 }
 0x32d   :  { %2698 = vmatprep.subr.bf16.mxu1 %v3236_v20 }
 0x3e5   :  { %v3548_v61 = vpop.f32.mrb[20].mxu1 }
 0x3e6   :  { %v2652_v24 = vpop.f32.mrb[21].mxu1 }
 0x3e7   :  { %v1210_v26 = vpop.f32.mrb[22].mxu1 }
 0x3e8   :  { %v2653_v27 = vpop.f32.mrb[23].mxu1 }
 0x3ed   :  { %v3550_v28 = vpop.f32.mrb[24].mxu1 }
 0x3ee   :  { %v2658_v40 = vpop.f32.mrb[25].mxu1 }
 0x3ef   :  { %v1256_v29 = vpop.f32.mrb[26].mxu1 }
 0x3f0   :  { %v2659_v30 = vpop.f32.mrb[27].mxu1 }
 0x3f6   :  { %v1427_v31 = vpop.f32.mrb[28].mxu1 }
 0x3f7   :  { %v2684_v32 = vpop.f32.mrb[29].mxu1  ;;  %v1473_v33 = vsel %vm1145_vm1, %v1427_v31, -inf }
 0x3f8   :  { %1474 = vmax.xlane.f32.xlu1 %v1473_v33  ;;  %v1430_v34 = vpop.f32.mrb[30].mxu1 }
 0x3f9   :  { %v2685_v35 = vpop.f32.mrb[31].mxu1 }
 0x3fe   :  { %v1467_v36 = vpop.f32.mrb[32].mxu1 }
 0x3ff   :  { %v2690_v37 = vpop.f32.mrb[33].mxu1  ;;  %v1476_v39 = vsel %vm1145_vm1, %v1467_v36, -inf }
 0x400   :  { %1477 = vmax.xlane.f32.xlu1 %v1476_v39  ;;  %v1470_v41 = vpop.f32.mrb[34].mxu1  ;;  %v1721_v39 = vpack.c.bf16 %v3503_v23, %v3503_v23  ;;  %v186_v23 = vrot.slane %v3461_v52, %v3475_v6  ;;  %v1053_v52 = vadd.f32 %v3500_v21, %v3498_v19  ;;  %v2975_v19 = vld [vmem:[#allocation13 + $0x8] sm:$0xff]  }
 0x401   :  { %v2691_v42 = vpop.f32.mrb[35].mxu1  ;;  %2663 = vmatpush3.bf16.msra.mxu0 %v2975_v19 }
 0x402   :  { %v441_v6 = vadd.f32 %v3454_v49, %v186_v23  ;;  %2664 = vmatprep.subr.bf16.mxu0 %v3236_v20 }
 0x485   :  { %v1475_v44 = vpop.xlane.xlu1 %1474 }
 0x486   :  { %v1479_v50 = vsub.f32 %v1427_v31, %v1475_v44  ;;  %v1872_v44 = vsel %vm1169_vm2, %v1721_v39, 0 }
 0x488   :  { %v1481_v51 = vmul.f32 1.442695, %v1479_v50 }
 0x48a   :  { %3010 = vpow2.f32 %v1481_v51 }
 0x48d   :  { %v1478_v53 = vpop.xlane.xlu1 %1477 }
 0x48e   :  { %v1480_v55 = vsub.f32 %v1467_v36, %v1478_v53  ;;  %v2047_v53 = vpack.c.bf16 %v3483_v12, %v3483_v12  ;;  %v2049_v12 = vpack.c.bf16 %v1053_v52, %v1053_v52 }
 0x490   :  { %v1483_v56 = vmul.f32 1.442695, %v1480_v55  ;;  %v437_v55 = vadd.f32 %v3446_v45, %v186_v23  ;;  %v2046_v45 = vpack.c.bf16 %v441_v6, %v441_v6 }
 0x492   :  { %3012 = vpow2.f32 %v1483_v56  ;;  %v2045_v56 = vpack.c.bf16 %v437_v55, %v437_v55 }
 0x494   :  { %v3556_v46 = vpop.eup %3010 }
 0x495   :  { %v1491_v59 = vpack.c.bf16 %v3556_v46, %v3556_v46 }
 0x497   :  { %2695 = vmatmul.mubr.msk.bf16.vlgmr.msra.gmra.mrb[36].mxu1 %vm1145_vm1, %v1491_v59  ;;  %v2155_v59 = vsel %vm1169_vm2, %v2049_v12, 0 }
 0x498   :  { %2699 = vmatpush3.bf16.msra.mxu1 %v1543_v60  ;;  %2700 = vmatprep.mubr.msk.bf16.mxu1 %vm3237_vm0, %v3236_v20 }
 0x499   :  { %2724 = vmatprep.subr.bf16.mxu1 %v3236_v20 }
 0x49c   :  { %v3565_v62 = vpop.eup %3012 }
 0x49d   :  { %v1492_v54 = vpack.c.bf16 %v3565_v62, %v3565_v62 }
 0x49f   :  { %2701 = vmatmul.mubr.msk.bf16.vlgmr.msra.gmra.mrb[40].mxu1 %vm1145_vm1, %v1492_v54 }
 0x4a0   :  { %2726 = vmatprep.mubr.msk.bf16.mxu1 %vm3237_vm0, %v3236_v20 }
 0x4a1   :  { %2725 = vmatpush3.bf16.xpose.msra.mxu1 %v1718_v2 }
 0x4a2   :  { %2730 = vmatprep.subr.bf16.mxu1 %v3236_v20 }
 0x4a8   :  { %2727 = vmatmul.mubr.bf16.vlgmr.msra.gmra.mrb[44].mxu1 %v1716_v7 }
 0x4a9   :  { %2731 = vmatpush3.bf16.xpose.msra.mxu1 %v1719_v8  ;;  %2732 = vmatprep.mubr.msk.bf16.mxu1 %vm3237_vm0, %v3236_v20 }
 0x4aa   :  { %2736 = vmatprep.subr.bf16.mxu1 %v3236_v20 }
 0x4b0   :  { %2733 = vmatmul.mubr.bf16.vlgmr.msra.gmra.mrb[48].mxu1 %v1717_v43 }
 0x4b1   :  { %2737 = vmatpush3.bf16.msra.mxu1 %v1826_v11  ;;  %2738 = vmatprep.mubr.msk.bf16.mxu1 %vm3237_vm0, %v3236_v20  ;;  %v1158_v11 = vsel %vm1145_vm1, %v3516_v1, 0.0  ;;  %v1488_v1 = vsel %vm1145_vm1, %v3565_v62, 0.0  ;;  %v2980_v62 = vld [vmem:[#allocation13 + $0x30] sm:$0xff]  }
 0x4b2   :  { %2742 = vmatprep.subr.bf16.mxu1 %v3236_v20 }
 0x56a   :  { %v3590_v14 = vpop.f32.mrb[36].mxu1 }
 0x56b   :  { %v2696_v17 = vpop.f32.mrb[37].mxu1 }
 0x56c   :  { %v1536_v18 = vpop.f32.mrb[38].mxu1 }
 0x56d   :  { %v2697_v13 = vpop.f32.mrb[39].mxu1 }
 0x56e   :  { %v1485_v13 = vsel %vm1145_vm1, %v3556_v46, 0.0 }
 0x572   :  { %v3592_v15 = vpop.f32.mrb[40].mxu1 }
 0x573   :  { %v2702_v47 = vpop.f32.mrb[41].mxu1 }
 0x574   :  { %v1582_v16 = vpop.f32.mrb[42].mxu1 }
 0x575   :  { %v2703_v48 = vpop.f32.mrb[43].mxu1 }
 0x57b   :  { %v1756_v57 = vpop.f32.mrb[44].mxu1 }
 0x57c   :  { %v2728_v22 = vpop.f32.mrb[45].mxu1  ;;  %v1802_v38 = vsel %vm1145_vm1, %v1756_v57, -inf }
 0x57d   :  { %1803 = vmax.xlane.f32.xlu0 %v1802_v38  ;;  %v1759_v24 = vpop.f32.mrb[46].mxu1  ;;  %v1161_v22 = vsel %vm1145_vm1, %v3525_v4, 0.0  ;;  %v2976_v38 = vld [vmem:[#allocation13 + $0x10] sm:$0xff]   ;;  %v2979_v4 = vld [vmem:[#allocation13 + $0x28] sm:$0xff]  }
 0x57e   :  { %v2729_v26 = vpop.f32.mrb[47].mxu1  ;;  %2665 = vmatpush3.bf16.msra.mxu0 %v2976_v38  ;;  %v2977_v24 = vld [vmem:[#allocation13 + $0x18] sm:$0xff]   ;;  %v3003_v38 = vld [vmem:[#allocation13 + $0xe8] sm:$0xff]  }
 0x57f   :  { %2666 = vmatprep.subr.bf16.mxu0 %v3236_v20  ;;  %v2978_v26 = vld [vmem:[#allocation13 + $0x20] sm:$0xff]  }
 0x582   :  { %2667 = vmatpush3.bf16.msra.mxu0 %v2977_v24  ;;  %v3005_v24 = vld [vmem:[#allocation13 + $0xf8] sm:$0xff]  }
 0x583   :  { %v1796_v27 = vpop.f32.mrb[48].mxu1  ;;  %2668 = vmatprep.subr.bf16.mxu0 %v3236_v20 }
 0x584   :  { %v2734_v40 = vpop.f32.mrb[49].mxu1  ;;  %v1805_v29 = vsel %vm1145_vm1, %v1796_v27, -inf }
 0x585   :  { %1806 = vmax.xlane.f32.xlu1 %v1805_v29  ;;  %v1799_v30 = vpop.f32.mrb[50].mxu1 }
 0x586   :  { %v2735_v31 = vpop.f32.mrb[51].mxu1  ;;  %2669 = vmatpush3.bf16.msra.mxu0 %v2978_v26 }
 0x587   :  { %2670 = vmatprep.subr.bf16.mxu0 %v3236_v20 }
 0x58a   :  { %2671 = vmatpush3.bf16.msra.mxu0 %v2979_v4 }
 0x58b   :  { %2672 = vmatprep.subr.bf16.mxu0 %v3236_v20 }
 0x58e   :  { %2673 = vmatpush3.bf16.msra.mxu0 %v2980_v62 }
 0x58f   :  { %2674 = vmatprep.subr.bf16.mxu0 %v3236_v20 }
 0x60a   :  { %v1804_v32 = vpop.xlane.xlu0 %1803 }
 0x60b   :  { %v1808_v33 = vsub.f32 %v1756_v57, %v1804_v32 }
 0x60d   :  { %v1810_v34 = vmul.f32 1.442695, %v1808_v33 }
 0x60f   :  { %3014 = vpow2.f32 %v1810_v34 }
 0x612   :  { %v1807_v35 = vpop.xlane.xlu1 %1806 }
 0x613   :  { %v1809_v36 = vsub.f32 %v1796_v27, %v1807_v35  ;;  %v2981_v27 = vld [vmem:[#allocation13 + $0x38] sm:$0xff]  }
 0x614   :  { %2675 = vmatpush3.bf16.msra.mxu0 %v2981_v27 }
 0x615   :  { %v1812_v37 = vmul.f32 1.442695, %v1809_v36  ;;  %2704 = vmatprep.subr.bf16.mxu0 %v3236_v20 }
 0x617   :  { %3016 = vpow2.f32 %v1812_v37  ;;  %v2050_v37 = vpack.c.bf16 %v3506_v25, %v3506_v25 }
 0x619   :  { %v3015_v41 = vpop.eup %3014 }
 0x61a   :  { %v1820_v42 = vpack.c.bf16 %v3015_v41, %v3015_v41  ;;  %v1814_v57 = vsel %vm1145_vm1, %v3015_v41, 0.0 }
 0x61c   :  { %2739 = vmatmul.mubr.msk.bf16.vlgmr.msra.gmra.mrb[52].mxu1 %vm1145_vm1, %v1820_v42 }
 0x61d   :  { %2743 = vmatpush3.bf16.msra.mxu1 %v1872_v44  ;;  %2744 = vmatprep.mubr.msk.bf16.mxu1 %vm3237_vm0, %v3236_v20 }
 0x61e   :  { %2768 = vmatprep.subr.bf16.mxu1 %v3236_v20 }
 0x621   :  { %v3603_v50 = vpop.eup %3016 }
 0x622   :  { %v1821_v51 = vpack.c.bf16 %v3603_v50, %v3603_v50  ;;  %v1817_v46 = vsel %vm1145_vm1, %v3603_v50, 0.0 }
 0x624   :  { %2745 = vmatmul.mubr.msk.bf16.vlgmr.msra.gmra.mrb[56].mxu1 %vm1145_vm1, %v1821_v51  ;;  %v2201_v51 = vsel %vm1169_vm2, %v2050_v37, 0 }
 0x625   :  { %2770 = vmatprep.mubr.msk.bf16.mxu1 %vm3237_vm0, %v3236_v20 }
 0x626   :  { %2769 = vmatpush3.bf16.xpose.msra.mxu1 %v2047_v53 }
 0x627   :  { %2774 = vmatprep.subr.bf16.mxu1 %v3236_v20 }
 0x62d   :  { %2771 = vmatmul.mubr.bf16.vlgmr.msra.gmra.mrb[60].mxu1 %v2045_v56 }
 0x62e   :  { %2775 = vmatpush3.bf16.xpose.msra.mxu1 %v2048_v58  ;;  %2776 = vmatprep.mubr.msk.bf16.mxu1 %vm3237_vm0, %v3236_v20 }
 0x62f   :  { %2780 = vmatprep.subr.bf16.mxu1 %v3236_v20 }
 0x635   :  { %2777 = vmatmul.mubr.bf16.vlgmr.msra.gmra.mrb[64].mxu1 %v2046_v45 }
 0x636   :  { %2781 = vmatpush3.bf16.msra.mxu1 %v2155_v59  ;;  %2782 = vmatprep.mubr.msk.bf16.mxu1 %vm3237_vm0, %v3236_v20  ;;  %v2982_v59 = vld [vmem:[#allocation13 + $0x40] sm:$0xff]  }
 0x637   :  { %2786 = vmatprep.subr.bf16.mxu1 %v3236_v20 }
 0x6ef   :  { %v3630_v49 = vpop.f32.mrb[52].mxu1 }
 0x6f0   :  { %v2740_v21 = vpop.f32.mrb[53].mxu1 }
 0x6f1   :  { %v1865_v60 = vpop.f32.mrb[54].mxu1 }
 0x6f2   :  { %v2741_v54 = vpop.f32.mrb[55].mxu1 }
 0x6f7   :  { %v3632_v63 = vpop.f32.mrb[56].mxu1 }
 0x6f8   :  { %v2746_v2 = vpop.f32.mrb[57].mxu1 }
 0x6f9   :  { %v1911_v3 = vpop.f32.mrb[58].mxu1 }
 0x6fa   :  { %v2747_v7 = vpop.f32.mrb[59].mxu1  ;;  %v2983_v3 = vld [vmem:[#allocation13 + $0x48] sm:$0xff]  }
 0x700   :  { %v2085_v8 = vpop.f32.mrb[60].mxu1 }
 0x701   :  { %v2772_v5 = vpop.f32.mrb[61].mxu1  ;;  %v2131_v10 = vsel %vm1145_vm1, %v2085_v8, -inf }
 0x702   :  { %2132 = vmax.xlane.f32.xlu0 %v2131_v10  ;;  %v2088_v9 = vpop.f32.mrb[62].mxu1  ;;  %v2987_v5 = vld [vmem:[#allocation13 + $0x68] sm:$0xff]   ;;  %v2990_v10 = vld [vmem:[#allocation13 + $0x80] sm:$0xff]  }
 0x703   :  { %v2773_v43 = vpop.f32.mrb[63].mxu1  ;;  %v2991_v9 = vld [vmem:[#allocation13 + $0x88] sm:$0xff]  }
 0x704   :  { %v2992_v43 = vld [vmem:[#allocation13 + $0x90] sm:$0xff]  }
 0x706   :  { %1159 = vadd.xlane.f32.xlu0 %v1158_v11  ;;  %v2993_v11 = vld [vmem:[#allocation13 + $0x98] sm:$0xff]  }
 0x708   :  { %v2125_v17 = vpop.f32.mrb[64].mxu1 }
 0x709   :  { %v2778_v18 = vpop.f32.mrb[65].mxu1  ;;  %v2134_v47 = vsel %vm1145_vm1, %v2125_v17, -inf }
 0x70a   :  { %1486 = vadd.xlane.f32.xlu0 %v1485_v13  ;;  %2135 = vmax.xlane.f32.xlu1 %v2134_v47  ;;  %v2128_v16 = vpop.f32.mrb[66].mxu1  ;;  %v2995_v18 = vld [vmem:[#allocation13 + $0xa8] sm:$0xff]   ;;  %v2996_v13 = vld [vmem:[#allocation13 + $0xb0] sm:$0xff]   ;;  %v2997_v47 = vld [vmem:[#allocation13 + $0xb8] sm:$0xff]  }
 0x70b   :  { %v2779_v48 = vpop.f32.mrb[67].mxu1  ;;  %v2998_v16 = vld [vmem:[#allocation13 + $0xc0] sm:$0xff]  }
 0x70c   :  { %v2999_v48 = vld [vmem:[#allocation13 + $0xc8] sm:$0xff]  }
 0x70e   :  { %1815 = vadd.xlane.f32.xlu0 %v1814_v57  ;;  %1162 = vadd.xlane.f32.xlu1 %v1161_v22  ;;  %v3000_v57 = vld [vmem:[#allocation13 + $0xd0] sm:$0xff]   ;;  %v3001_v22 = vld [vmem:[#allocation13 + $0xd8] sm:$0xff]  }
 0x712   :  { %1489 = vadd.xlane.f32.xlu1 %v1488_v1  ;;  %v3002_v1 = vld [vmem:[#allocation13 + $0xe0] sm:$0xff]  }
 0x716   :  { %1818 = vadd.xlane.f32.xlu1 %v1817_v46  ;;  %v3004_v46 = vld [vmem:[#allocation13 + $0xf0] sm:$0xff]  }
 0x78f   :  { %v2133_v40 = vpop.xlane.xlu0 %2132 }
 0x790   :  { %v2137_v29 = vsub.f32 %v2085_v8, %v2133_v40  ;;  %v2986_v8 = vld [vmem:[#allocation13 + $0x60] sm:$0xff]  }
 0x792   :  { %v2139_v30 = vmul.f32 1.442695, %v2137_v29 }
 0x793   :  { %v1160_v31 = vpop.xlane.xlu0 %1159 }
 0x794   :  { %3018 = vpow2.f32 %v2139_v30 }
 0x795   :  { %3020 = vrcp.f32 %v1160_v31 }
 0x797   :  { %v2136_v32 = vpop.xlane.xlu1 %2135  ;;  %v1487_v34 = vpop.xlane.xlu0 %1486 }
 0x798   :  { %v2138_v33 = vsub.f32 %v2125_v17, %v2136_v32  ;;  %v2994_v17 = vld [vmem:[#allocation13 + $0xa0] sm:$0xff]  }
 0x79a   :  { %v2141_v35 = vmul.f32 1.442695, %v2138_v33 }
 0x79b   :  { %v1163_v36 = vpop.xlane.xlu1 %1162  ;;  %v1816_v41 = vpop.xlane.xlu0 %1815 }
 0x79c   :  { %3022 = vpow2.f32 %v2141_v35 }
 0x79d   :  { %3024 = vrcp.f32 %v1487_v34 }
 0x79e   :  { %v3019_v39 = vpop.eup %3018  ;;  %3026 = vrcp.f32 %v1163_v36 }
 0x79f   :  { %v1490_v42 = vpop.xlane.xlu1 %1489  ;;  %v2143_v44 = vsel %vm1145_vm1, %v3019_v39, 0.0  ;;  %v2149_v50 = vpack.c.bf16 %v3019_v39, %v3019_v39  ;;  %v3021_v23 = vpop.eup %3020 }
 0x7a0   :  { %3028 = vrcp.f32 %v1490_v42  ;;  %2144 = vadd.xlane.f32.xlu0 %v2143_v44  ;;  %v1261_v6 = vmul.f32 %v3021_v23, %v3548_v61 }
 0x7a1   :  { %2783 = vmatmul.mubr.msk.bf16.vlgmr.msra.gmra.mrb[68].mxu1 %vm1145_vm1, %v2149_v50  ;;  %3030 = vrcp.f32 %v1816_v41 }
 0x7a2   :  { %2787 = vmatpush3.bf16.msra.mxu1 %v2201_v51  ;;  %2788 = vmatprep.mubr.msk.bf16.mxu1 %vm3237_vm0, %v3236_v20 }
 0x7a3   :  { %v1819_v25 = vpop.xlane.xlu1 %1818 }
 0x7a4   :  { %3032 = vrcp.f32 %v1819_v25 }
 0x7a6   :  { %v3023_v53 = vpop.eup %3022 }
 0x7a7   :  { %v3025_v55 = vpop.eup %3024  ;;  %v2146_v56 = vsel %vm1145_vm1, %v3023_v53, 0.0  ;;  %v2150_v58 = vpack.c.bf16 %v3023_v53, %v3023_v53  ;;  %v2508_v53 = vld [vmem:[%s3734_s10 + $0x1] ss:$0 sm:$0xff] }
 0x7a8   :  { %v3027_v52 = vpop.eup %3026  ;;  %2147 = vadd.xlane.f32.xlu1 %v2146_v56  ;;  %v1587_v19 = vmul.f32 %v3025_v55, %v3590_v14  ;;  %v2984_v14 = vld [vmem:[#allocation13 + $0x50] sm:$0xff]  }
 0x7a9   :  { %2789 = vmatmul.mubr.msk.bf16.vlgmr.msra.gmra.mrb[72].mxu1 %vm1145_vm1, %v2150_v58  ;;  %v1262_v12 = vmul.f32 %v3027_v52, %v3550_v28 }
 0x7aa   :  { %v3029_v45 = vpop.eup %3028 }
 0x7ab   :  { %v2544_v0 = vpack.c.bf16 %v1262_v12, %v1261_v6  ;;  %v1588_v21 = vmul.f32 %v3029_v45, %v3592_v15  ;;  %v3031_v60 = vpop.eup %3030  ;;  %v2985_v15 = vld [vmem:[#allocation13 + $0x58] sm:$0xff]  }
 0x7ac   :  { %v1916_v61 = vmul.f32 %v3031_v60, %v3630_v49  ;;  %v2988_v49 = vld [vmem:[#allocation13 + $0x70] sm:$0xff]  }
 0x7ad   :  { %2677 = vmatmul.mubr.bf16.vlgmr.msra.gmra.mrb[12].mxu0 %v2544_v0  ;;  %v2545_v54 = vpack.c.bf16 %v1588_v21, %v1587_v19 }
 0x7ae   :  { %v3033_v2 = vpop.eup %3032  ;;  %2705 = vmatpush3.bf16.msra.mxu0 %v2982_v59  ;;  %2720 = vmatprep.mubr.msk.bf16.mxu0 %vm3237_vm0, %v3236_v20  ;;  %v2521_v59 = vld [vmem:[%s3734_s10 + $0x2] ss:$0 sm:$0xff] }
 0x7af   :  { %2706 = vmatprep.subr.bf16.mxu0 %v3236_v20  ;;  %v1917_v28 = vmul.f32 %v3033_v2, %v3632_v63  ;;  %v2989_v63 = vld [vmem:[#allocation13 + $0x78] sm:$0xff]  }
 0x7b1   :  { %v2546_v7 = vpack.c.bf16 %v1917_v28, %v1916_v61  ;;  %v2534_v61 = vld [vmem:[%s3734_s10 + $0x3] ss:$0 sm:$0xff] }
 0x7b2   :  { %2707 = vmatpush3.bf16.msra.mxu0 %v2983_v3 }
 0x7b3   :  { %2708 = vmatprep.subr.bf16.mxu0 %v3236_v20 }
 0x7b6   :  { %2709 = vmatpush3.bf16.msra.mxu0 %v2984_v14 }
 0x7b7   :  { %2710 = vmatprep.subr.bf16.mxu0 %v3236_v20 }
 0x7ba   :  { %2711 = vmatpush3.bf16.msra.mxu0 %v2985_v15 }
 0x7bb   :  { %2712 = vmatprep.subr.bf16.mxu0 %v3236_v20 }
 0x7be   :  { %2713 = vmatpush3.bf16.msra.mxu0 %v2986_v8 }
 0x7bf   :  { %2714 = vmatprep.subr.bf16.mxu0 %v3236_v20 }
 0x7c2   :  { %2715 = vmatpush3.bf16.msra.mxu0 %v2987_v5 }
 0x7c3   :  { %2716 = vmatprep.subr.bf16.mxu0 %v3236_v20 }
 0x7c6   :  { %2717 = vmatpush3.bf16.msra.mxu0 %v2988_v49 }
 0x7c7   :  { %2718 = vmatprep.subr.bf16.mxu0 %v3236_v20 }
 0x7ca   :  { %2719 = vmatpush3.bf16.msra.mxu0 %v2989_v63 }
 0x7cb   :  { %2748 = vmatprep.subr.bf16.mxu0 %v3236_v20 }
 0x7cd   :  { %2721 = vmatmul.mubr.bf16.vlgmr.msra.gmra.mrb[16].mxu0 %v2545_v54 }
 0x7ce   :  { %2749 = vmatpush3.bf16.msra.mxu0 %v2990_v10  ;;  %2764 = vmatprep.mubr.msk.bf16.mxu0 %vm3237_vm0, %v3236_v20 }
 0x7cf   :  { %2750 = vmatprep.subr.bf16.mxu0 %v3236_v20 }
 0x7d2   :  { %2751 = vmatpush3.bf16.msra.mxu0 %v2991_v9 }
 0x7d3   :  { %2752 = vmatprep.subr.bf16.mxu0 %v3236_v20 }
 0x7d6   :  { %2753 = vmatpush3.bf16.msra.mxu0 %v2992_v43 }
 0x7d7   :  { %2754 = vmatprep.subr.bf16.mxu0 %v3236_v20 }
 0x7da   :  { %2755 = vmatpush3.bf16.msra.mxu0 %v2993_v11 }
 0x7db   :  { %2756 = vmatprep.subr.bf16.mxu0 %v3236_v20 }
 0x7de   :  { %2757 = vmatpush3.bf16.msra.mxu0 %v2994_v17 }
 0x7df   :  { %2758 = vmatprep.subr.bf16.mxu0 %v3236_v20 }
 0x7e2   :  { %2759 = vmatpush3.bf16.msra.mxu0 %v2995_v18 }
 0x7e3   :  { %2760 = vmatprep.subr.bf16.mxu0 %v3236_v20 }
 0x7e6   :  { %2761 = vmatpush3.bf16.msra.mxu0 %v2996_v13 }
 0x7e7   :  { %2762 = vmatprep.subr.bf16.mxu0 %v3236_v20 }
 0x7ea   :  { %2763 = vmatpush3.bf16.msra.mxu0 %v2997_v47 }
 0x7eb   :  { %2792 = vmatprep.subr.bf16.mxu0 %v3236_v20 }
 0x7ed   :  { %2765 = vmatmul.mubr.bf16.vlgmr.msra.gmra.mrb[20].mxu0 %v2546_v7 }
 0x7ee   :  { %2793 = vmatpush3.bf16.msra.mxu0 %v2998_v16  ;;  %2808 = vmatprep.mubr.msk.bf16.mxu0 %vm3237_vm0, %v3236_v20 }
 0x7ef   :  { %2794 = vmatprep.subr.bf16.mxu0 %v3236_v20 }
 0x7f2   :  { %2795 = vmatpush3.bf16.msra.mxu0 %v2999_v48 }
 0x7f3   :  { %2796 = vmatprep.subr.bf16.mxu0 %v3236_v20 }
 0x7f6   :  { %2797 = vmatpush3.bf16.msra.mxu0 %v3000_v57 }
 0x7f7   :  { %2798 = vmatprep.subr.bf16.mxu0 %v3236_v20 }
 0x7fa   :  { %2799 = vmatpush3.bf16.msra.mxu0 %v3001_v22 }
 0x7fb   :  { %2800 = vmatprep.subr.bf16.mxu0 %v3236_v20 }
 0x7fe   :  { %2801 = vmatpush3.bf16.msra.mxu0 %v3002_v1 }
 0x7ff   :  { %2802 = vmatprep.subr.bf16.mxu0 %v3236_v20 }
 0x802   :  { %2803 = vmatpush3.bf16.msra.mxu0 %v3003_v38 }
 0x803   :  { %2804 = vmatprep.subr.bf16.mxu0 %v3236_v20 }
 0x806   :  { %2805 = vmatpush3.bf16.msra.mxu0 %v3004_v46 }
 0x807   :  { %2806 = vmatprep.subr.bf16.mxu0 %v3236_v20  ;;  %v2495_v20 = vld [vmem:[%s3734_s10] ss:$0 sm:$0xff] }
 0x80a   :  { %2807 = vmatpush3.bf16.msra.mxu0 %v3005_v24 }
 0x82d   :  { %v2145_v26 = vpop.xlane.xlu0 %2144 }
 0x82e   :  { %3034 = vrcp.f32 %v2145_v26 }
 0x835   :  { %v2148_v4 = vpop.xlane.xlu1 %2147 }
 0x836   :  { %3036 = vrcp.f32 %v2148_v4 }
 0x838   :  { %v3035_v30 = vpop.eup %3034 }
 0x840   :  { %v3037_v31 = vpop.eup %3036 }
 0x874   :  { %v2191_v62 = vpop.f32.mrb[68].mxu1 }
 0x875   :  { %v2784_v27 = vpop.f32.mrb[69].mxu1  ;;  %v2245_v33 = vmul.f32 %v3035_v30, %v2191_v62 }
 0x876   :  { %v2194_v40 = vpop.f32.mrb[70].mxu1 }
 0x877   :  { %v2785_v29 = vpop.f32.mrb[71].mxu1 }
 0x87c   :  { %v2237_v32 = vpop.f32.mrb[72].mxu1 }
 0x87d   :  { %v2246_v34 = vmul.f32 %v3037_v31, %v2237_v32  ;;  %v2790_v35 = vpop.f32.mrb[73].mxu1 }
 0x87e   :  { %v2240_v36 = vpop.f32.mrb[74].mxu1 }
 0x87f   :  { %v2547_v37 = vpack.c.bf16 %v2246_v34, %v2245_v33  ;;  %v2791_v39 = vpop.f32.mrb[75].mxu1 }
 0x880   :  { %v1376_v41 = vpop.f32.mrb[12].mxu0 }
 0x881   :  { %v2678_v42 = vpop.f32.mrb[13].mxu0  ;;  %2809 = vmatmul.mubr.bf16.vlgmr.msra.gmra.mrb[24].mxu0 %v2547_v37  ;;  %v1377_v50 = vadd.f32 %v2495_v20, %v1376_v41 }
 0x882   :  { %v1379_v44 = vpop.f32.mrb[14].mxu0 }
 0x883   :  { %v1380_v51 = vadd.f32 %v2495_v20, %v1379_v44  ;;  %v2679_v25 = vpop.f32.mrb[15].mxu0 }
 0x885   :  { %v2551_v23 = vpack.c.bf16 %v1380_v51, %v1377_v50 }
 0x887   :  { %2552 = vst [vmem:[#allocation14] sm:$0xff] %v2551_v23  }
 0x8a0   :  { %v1704_v55 = vpop.f32.mrb[16].mxu0 }
 0x8a1   :  { %v2722_v56 = vpop.f32.mrb[17].mxu0  ;;  %v1705_v52 = vadd.f32 %v2508_v53, %v1704_v55 }
 0x8a2   :  { %v1707_v58 = vpop.f32.mrb[18].mxu0 }
 0x8a3   :  { %v1708_v6 = vadd.f32 %v2508_v53, %v1707_v58  ;;  %v2723_v12 = vpop.f32.mrb[19].mxu0 }
 0x8a5   :  { %v2556_v45 = vpack.c.bf16 %v1708_v6, %v1705_v52 }
 0x8a7   :  { %2557 = vst [vmem:[#allocation14 + $0x8] sm:$0xff] %v2556_v45  }
 0x8c0   :  { %v2033_v0 = vpop.f32.mrb[20].mxu0 }
 0x8c1   :  { %v2766_v19 = vpop.f32.mrb[21].mxu0  ;;  %v2034_v60 = vadd.f32 %v2521_v59, %v2033_v0 }
 0x8c2   :  { %v2036_v21 = vpop.f32.mrb[22].mxu0 }
 0x8c3   :  { %v2037_v54 = vadd.f32 %v2521_v59, %v2036_v21  ;;  %v2767_v2 = vpop.f32.mrb[23].mxu0 }
 0x8c5   :  { %v2561_v3 = vpack.c.bf16 %v2037_v54, %v2034_v60 }
 0x8c7   :  { %2562 = vst [vmem:[#allocation14 + $0x10] sm:$0xff] %v2561_v3  }
 0x954   :  { %v2362_v28 = vpop.f32.mrb[24].mxu0 }
 0x955   :  { %v2810_v7 = vpop.f32.mrb[25].mxu0  ;;  %v2363_v15 = vadd.f32 %v2534_v61, %v2362_v28 }
 0x956   :  { %v2365_v14 = vpop.f32.mrb[26].mxu0 }
 0x957   :  { %v2366_v8 = vadd.f32 %v2534_v61, %v2365_v14  ;;  %v2811_v5 = vpop.f32.mrb[27].mxu0 }
 0x959   :  { %v2566_v49 = vpack.c.bf16 %v2366_v8, %v2363_v15 }
 0x95b   :  { %2567 = vst [vmem:[#allocation14 + $0x18] sm:$0xff] %v2566_v49  }
 0x95c   :  { %3203 = shalt.err (!%p3200_p4)
}
 0x95d   :  { %s3204_s24 = scalar_lea.hbm %s3735_s11, 512 }
 0x95e   :  { %p3205_p5 = scmp.ne.s32.totalorder %s3735_s11, %s3204_s24  ;;  %p3208_p6 = scmp.lt.u32.totalorder %s3204_s24, %s3735_s11 }
 0x960   :  { %p3210_p7 = pnand %p3208_p6, %p3205_p5 }
 0x962   :  { %3213 = shalt.err (!%p3210_p7)
}
 0x963   :  { %2385 = dma.vmem_to_hbm [thread:$0]  %s2380_s20, 512, %s3735_s11, [#allocation4], %s3226_s29, %s3226_s29, %s3227_s30  }
 0x964   :  { %3222 = dma.done.wait [#allocation4], 512  }
 0x965   :  { %3223 = vsyncadd [#allocation4], 4294966784 }
 0x966   :  { %2389 = vsyncpa [#allocation3], 1 }
 0x967   :  { %2390 = vsyncpa [#allocation6], 1 }
 0x968   :  { %2391 = vsyncpa [#allocation9], 1 }
 0x969   :  { %2392 = vsyncpa [#allocation12], 1 }
 0x96a   :  { %2393 = vsyncpa [#allocation4], 1 }

</bundles_post_ra>
